<compile_context>
chip_gen: v6e
topology: v6e:2x2x1
jax: 0.10.0
libtpu: 0.0.40
codegen_flags: <defaults>
</compile_context>

<pallas_src>
import functools
import numpy as np
import jax
import jax.numpy as jnp
from jax import lax
from jax.experimental import pallas as pl
from jax.experimental.pallas import tpu as pltpu


def _silu(x):
    return x * jax.nn.sigmoid(x)


def _round_up(x, m):
    return ((x + m - 1) // m) * m


def egcl_kernel(h_ref, ea_ref, row_ref, col_ref, emask_ref, flags_ref,
                w1a_ref, w1b_ref, w1c_ref, b1_ref,
                w2_ref, b2_ref, watt_ref, batt_ref,
                wn1a_ref, wn1b_ref, bn1_ref, wn2_ref, bn2_ref,
                out_ref,
                hw_row_scr, hw_col_scr, agg_scr,
                *, compute_dtype):
    e = pl.program_id(0)
    n_steps = pl.num_programs(0)
    N = agg_scr.shape[0]
    tE = ea_ref.shape[0]

    # ---- first tile: project h once ([N,D]@[D,H]) and zero the aggregator -------------
    @pl.when(e == 0)
    def _init():
        h = h_ref[...]
        hw_row_scr[...] = jnp.dot(h, w1a_ref[...], preferred_element_type=jnp.float32)
        hw_col_scr[...] = jnp.dot(h, w1b_ref[...], preferred_element_type=jnp.float32)
        agg_scr[...] = jnp.zeros_like(agg_scr)

    cd = lambda x: x.astype(compute_dtype)

    # ---- per-tile one-hots built from lane-dense [1, tE] edge indices -----------------
    node_iota = lax.broadcasted_iota(jnp.int32, (N, tE), 0)
    row_oh = (node_iota == row_ref[...]).astype(compute_dtype)      # [N, tE]
    col_oh = (node_iota == col_ref[...]).astype(compute_dtype)      # [N, tE]

    # ---- msg_mlp: Linear(2D+Fe -> H) + SiLU + Linear(H -> H) + SiLU --------------------
    # hrow @ W1a == onehot_row^T @ (h @ W1a): contract dim 0 of both operands (exact for
    # 0/1 one-hots).  The small K=Fe edge_attr term stays a plain MXU pass.
    dn = (((0,), (0,)), ((), ()))
    m = (lax.dot_general(row_oh, cd(hw_row_scr[...]), dn, preferred_element_type=jnp.float32)
         + lax.dot_general(col_oh, cd(hw_col_scr[...]), dn, preferred_element_type=jnp.float32)
         + jnp.dot(cd(ea_ref[...]), cd(w1c_ref[...]), preferred_element_type=jnp.float32)
         + b1_ref[...])
    m = _silu(m)
    m = _silu(jnp.dot(cd(m), cd(w2_ref[...]), preferred_element_type=jnp.float32) + b2_ref[...])

    # ---- att_mlp as a lane reduction (VPU/XLU) instead of an H->1 MXU matmul -----------
    att = jax.nn.sigmoid(jnp.sum(m * watt_ref[...], axis=-1, keepdims=True) + batt_ref[...])
    m = m * att                                                      # [tE, H]

    # ---- masked scatter-add:  agg += (onehot_row * edge_mask) @ m  (canonical MXU) -----
    row_oh_masked = row_oh * emask_ref[...].astype(compute_dtype)    # [N, tE]
    agg_scr[...] += jnp.dot(row_oh_masked, cd(m), preferred_element_type=jnp.float32)

    # ---- last tile: node_mlp, residual, flags ------------------------------------------
    @pl.when(e == n_steps - 1)
    def _finalize():
        h = h_ref[...]
        n1 = _silu(jnp.dot(h, wn1a_ref[...], preferred_element_type=jnp.float32)
                   + jnp.dot(agg_scr[...], wn1b_ref[...], preferred_element_type=jnp.float32)
                   + bn1_ref[...])
        n2 = jnp.dot(n1, wn2_ref[...], preferred_element_type=jnp.float32) + bn2_ref[...]
        out_ref[...] = ((h + n2) * flags_ref[...]).astype(out_ref.dtype)


def egcl_pallas(h, edge_index, edge_attr, flags, edge_mask, params,
                *, edge_tile=512, compute_dtype=jnp.float32):
    """h:[N,D] f32, edge_index:[2,E] i32, edge_attr:[E,Fe] f32, flags:[N,1], edge_mask:[E,1].

    edge_tile: edges per grid step.  Per-step pipelined VMEM is ~2 buffers x tE*(Fe+3)*4 B
      plus in-register [N,tE] one-hots / [tE,H] messages; the resident part (h, weights,
      three [N,H] scratches) is small.  ~2048 is a good ceiling on v7x (64 MiB physical
      VMEM), ~4096 on v5e/v6e; 512 stays far inside every generation's default scoped
      VMEM limit at these feature sizes, so vmem_limit_bytes is left at its default.
    compute_dtype: dtype fed to the per-edge MXU matmuls (one-hots/masks are exact in
      bf16).  Use jnp.bfloat16 on v6e/v7x for ~2-4x MXU throughput at ~1e-2 tolerance.
    """
    row, col = edge_index[0], edge_index[1]
    N, D = h.shape
    E, Fe = edge_attr.shape
    H = params['w2'].shape[0]

    # --- tile / pad the edge dimension (padded edges get edge_mask = 0 -> no effect) ---
    tE = _round_up(min(edge_tile, _round_up(E, 128)), 128)
    E_pad = _round_up(E, tE)
    pad = E_pad - E

    ea_p = jnp.pad(edge_attr, ((0, pad), (0, 0)))
    row_p = jnp.pad(row.astype(jnp.int32), (0, pad)).reshape(1, E_pad)
    col_p = jnp.pad(col.astype(jnp.int32), (0, pad)).reshape(1, E_pad)
    emask_p = jnp.pad(edge_mask.reshape(E).astype(jnp.float32), (0, pad)).reshape(1, E_pad)

    # --- split concat-weights (glue; avoids odd-width concats inside the kernel) -------
    w1a, w1b, w1c = params['w1'][:D], params['w1'][D:2 * D], params['w1'][2 * D:]
    wn1a, wn1b = params['wn1'][:D], params['wn1'][D:]
    watt_row = params['watt'].reshape(1, H)          # lane-dense attention weight row

    inputs = (h, ea_p, row_p, col_p, emask_p, flags.astype(jnp.float32),
              w1a, w1b, w1c, params['b1'].reshape(1, H),
              params['w2'], params['b2'].reshape(1, H),
              watt_row, params['batt'].reshape(1, 1),
              wn1a, wn1b, params['bn1'].reshape(1, H),
              params['wn2'], params['bn2'].reshape(1, H))

    resident = lambda shape: pl.BlockSpec(shape, lambda e: (0, 0))   # fetched once
    in_specs = [
        resident((N, D)),                               # h
        pl.BlockSpec((tE, Fe), lambda e: (e, 0)),       # edge_attr tile
        pl.BlockSpec((1, tE), lambda e: (0, e)),        # row ids (lane-dense)
        pl.BlockSpec((1, tE), lambda e: (0, e)),        # col ids (lane-dense)
        pl.BlockSpec((1, tE), lambda e: (0, e)),        # edge mask (lane-dense)
        resident((N, 1)),                               # flags
        resident((D, H)), resident((D, H)), resident((Fe, H)), resident((1, H)),   # W1a/b/c, b1
        resident((H, H)), resident((1, H)),             # W2, b2
        resident((1, H)), resident((1, 1)),             # watt (row layout), batt
        resident((D, H)), resident((H, H)), resident((1, H)),                      # Wn1a/b, bn1
        resident((H, H)), resident((1, H)),             # Wn2, bn2
    ]

    # Advisory cost estimate for the XLA scheduler (rough).
    flops = int(2 * E_pad * H * (3 * N + Fe + H) + 2 * N * H * (3 * D + 3 * H))
    transcendentals = int(E_pad * (3 * H + 1) + N * H)
    bytes_accessed = int(4 * (h.size + ea_p.size + row_p.size + col_p.size + emask_p.size
                              + flags.size + N * H)
                         + 4 * sum(int(np.prod(params[k].shape)) for k in params))

    kernel = functools.partial(egcl_kernel, compute_dtype=compute_dtype)

    # NOTE: on v7x a further "parallel" grid axis over destination-node blocks could use
    # both TensorCores; omitted here since it duplicates the edge MLP unless edges are
    # pre-sorted by destination.
    return pl.pallas_call(
        kernel,
        out_shape=jax.ShapeDtypeStruct((N, H), jnp.float32),
        grid=(E_pad // tE,),
        in_specs=in_specs,
        out_specs=pl.BlockSpec((N, H), lambda e: (0, 0)),
        scratch_shapes=[pltpu.VMEM((N, H), jnp.float32),   # h @ W1a
                        pltpu.VMEM((N, H), jnp.float32),   # h @ W1b
                        pltpu.VMEM((N, H), jnp.float32)],  # agg accumulator
        compiler_params=pltpu.CompilerParams(dimension_semantics=("arbitrary",)),
        cost_estimate=pl.CostEstimate(flops=flops, transcendentals=transcendentals,
                                      bytes_accessed=bytes_accessed),
    )(*inputs)


def egcl_reference(h, edge_index, edge_attr, flags, edge_mask, p):
    """Pure-JAX reference mirroring the PyTorch forward."""
    row, col = edge_index[0], edge_index[1]
    msg = jnp.concatenate([h[row], h[col], edge_attr], axis=1)
    m = _silu(msg @ p['w1'] + p['b1'])
    m = _silu(m @ p['w2'] + p['b2'])
    att = jax.nn.sigmoid(m @ p['watt'] + p['batt'])
    m = m * att * edge_mask
    agg = jnp.zeros((h.shape[0], m.shape[1]), m.dtype).at[row].add(m)
    agg = jnp.concatenate([h, agg], axis=1)
    out = h + (_silu(agg @ p['wn1'] + p['bn1']) @ p['wn2'] + p['bn2'])
    return out * flags


def init_params(key, in_dim, out_dim, edge_dim):
    """Deterministic init mimicking nn.Linear default (uniform +-1/sqrt(fan_in))."""
    def linear(k, fan_in, fan_out):
        kw, kb = jax.random.split(k)
        bound = 1.0 / np.sqrt(fan_in)
        w = jax.random.uniform(kw, (fan_in, fan_out), jnp.float32, -bound, bound)
        b = jax.random.uniform(kb, (fan_out,), jnp.float32, -bound, bound)
        return w, b

    ks = jax.random.split(key, 5)
    w1, b1 = linear(ks[0], 2 * in_dim + edge_dim, out_dim)
    w2, b2 = linear(ks[1], out_dim, out_dim)
    watt, batt = linear(ks[2], out_dim, 1)
    wn1, bn1 = linear(ks[3], in_dim + out_dim, out_dim)
    wn2, bn2 = linear(ks[4], out_dim, out_dim)
    return dict(w1=w1, b1=b1, w2=w2, b2=b2, watt=watt, batt=batt,
                wn1=wn1, bn1=bn1, wn2=wn2, bn2=bn2)


if __name__ == "__main__":
    # Fully-connected graph: N nodes, E = N*N edges.  Residual requires in_dim == out_dim.
    N, in_dim, out_dim, edge_dim = 16, 32, 32, 4
    E = N * N

    key = jax.random.PRNGKey(0)
    k_h, k_ea, k_fl, k_em, k_p = jax.random.split(key, 5)

    h = jax.random.normal(k_h, (N, in_dim), jnp.float32)
    edge_attr = jax.random.normal(k_ea, (E, edge_dim), jnp.float32)

    rows = jnp.repeat(jnp.arange(N, dtype=jnp.int32), N)
    cols = jnp.tile(jnp.arange(N, dtype=jnp.int32), N)
    edge_index = jnp.stack([rows, cols], axis=0)            # [2, E]

    flags = (jax.random.uniform(k_fl, (N, 1)) > 0.2).astype(jnp.float32)
    edge_mask = (jax.random.uniform(k_em, (E, 1)) > 0.3).astype(jnp.float32)

    params = init_params(k_p, in_dim, out_dim, edge_dim)

    # edge_tile=128 -> 2 grid steps: exercises the accumulator + init/finalize phases.
    out = egcl_pallas(h, edge_index, edge_attr, flags, edge_mask, params, edge_tile=128)
    out = jax.block_until_ready(out)

    ref = egcl_reference(h, edge_index, edge_attr, flags, edge_mask, params)
    np.testing.assert_allclose(np.asarray(out), np.asarray(ref), rtol=1e-4, atol=1e-4)

    print("KERNEL_OK")
</pallas_src>

<mosaic_0001>
module attributes {stable_mosaic.version = 11 : i64} {
  func.func @egcl_kernel(%arg0: i32, %arg1: memref<16x32xf32, #tpu.memory_space<vmem>>, %arg2: memref<128x4xf32, #tpu.memory_space<vmem>>, %arg3: memref<1x128xi32, #tpu.memory_space<vmem>>, %arg4: memref<1x128xi32, #tpu.memory_space<vmem>>, %arg5: memref<1x128xf32, #tpu.memory_space<vmem>>, %arg6: memref<16x1xf32, #tpu.memory_space<vmem>>, %arg7: memref<32x32xf32, #tpu.memory_space<vmem>>, %arg8: memref<32x32xf32, #tpu.memory_space<vmem>>, %arg9: memref<4x32xf32, #tpu.memory_space<vmem>>, %arg10: memref<1x32xf32, #tpu.memory_space<vmem>>, %arg11: memref<32x32xf32, #tpu.memory_space<vmem>>, %arg12: memref<1x32xf32, #tpu.memory_space<vmem>>, %arg13: memref<1x32xf32, #tpu.memory_space<vmem>>, %arg14: memref<1x1xf32, #tpu.memory_space<vmem>>, %arg15: memref<32x32xf32, #tpu.memory_space<vmem>>, %arg16: memref<32x32xf32, #tpu.memory_space<vmem>>, %arg17: memref<1x32xf32, #tpu.memory_space<vmem>>, %arg18: memref<32x32xf32, #tpu.memory_space<vmem>>, %arg19: memref<1x32xf32, #tpu.memory_space<vmem>>, %arg20: memref<16x32xf32, #tpu.memory_space<vmem>>, %arg21: memref<16x32xf32, #tpu.memory_space<vmem>>, %arg22: memref<16x32xf32, #tpu.memory_space<vmem>>, %arg23: memref<16x32xf32, #tpu.memory_space<vmem>>) attributes {dimension_semantics = [#tpu.dimension_semantics<arbitrary>], iteration_bounds = array<i64: 2>, scalar_prefetch = 0 : i64, scratch_operands = 3 : i64, tpu.core_type = #tpu.core_type<tc>, window_params = [{pipeline_mode = #tpu.pipeline_mode<synchronous>, transform_indices = @transform_0, window_bounds = array<i64: 16, 32>}, {transform_indices = @transform_1, window_bounds = array<i64: 128, 4>}, {transform_indices = @transform_2, window_bounds = array<i64: 1, 128>}, {transform_indices = @transform_3, window_bounds = array<i64: 1, 128>}, {transform_indices = @transform_4, window_bounds = array<i64: 1, 128>}, {pipeline_mode = #tpu.pipeline_mode<synchronous>, transform_indices = @transform_5, window_bounds = array<i64: 16, 1>}, {pipeline_mode = #tpu.pipeline_mode<synchronous>, transform_indices = @transform_6, window_bounds = array<i64: 32, 32>}, {pipeline_mode = #tpu.pipeline_mode<synchronous>, transform_indices = @transform_7, window_bounds = array<i64: 32, 32>}, {pipeline_mode = #tpu.pipeline_mode<synchronous>, transform_indices = @transform_8, window_bounds = array<i64: 4, 32>}, {pipeline_mode = #tpu.pipeline_mode<synchronous>, transform_indices = @transform_9, window_bounds = array<i64: 1, 32>}, {pipeline_mode = #tpu.pipeline_mode<synchronous>, transform_indices = @transform_10, window_bounds = array<i64: 32, 32>}, {pipeline_mode = #tpu.pipeline_mode<synchronous>, transform_indices = @transform_11, window_bounds = array<i64: 1, 32>}, {pipeline_mode = #tpu.pipeline_mode<synchronous>, transform_indices = @transform_12, window_bounds = array<i64: 1, 32>}, {pipeline_mode = #tpu.pipeline_mode<synchronous>, transform_indices = @transform_13, window_bounds = array<i64: 1, 1>}, {pipeline_mode = #tpu.pipeline_mode<synchronous>, transform_indices = @transform_14, window_bounds = array<i64: 32, 32>}, {pipeline_mode = #tpu.pipeline_mode<synchronous>, transform_indices = @transform_15, window_bounds = array<i64: 32, 32>}, {pipeline_mode = #tpu.pipeline_mode<synchronous>, transform_indices = @transform_16, window_bounds = array<i64: 1, 32>}, {pipeline_mode = #tpu.pipeline_mode<synchronous>, transform_indices = @transform_17, window_bounds = array<i64: 32, 32>}, {pipeline_mode = #tpu.pipeline_mode<synchronous>, transform_indices = @transform_18, window_bounds = array<i64: 1, 32>}, {pipeline_mode = #tpu.pipeline_mode<synchronous>, transform_indices = @transform_19, window_bounds = array<i64: 16, 32>}]} {
    %c0_i32 = arith.constant 0 : i32
    %0 = arith.cmpi eq, %arg0, %c0_i32 : i32
    %1 = arith.extui %0 : i1 to i32
    %c0_i32_0 = arith.constant 0 : i32
    %2 = arith.cmpi ne, %1, %c0_i32_0 : i32
    scf.if %2 {
      %c0_37 = arith.constant 0 : index
      %c0_38 = arith.constant 0 : index
      %68 = vector.load %arg1[%c0_37, %c0_38] : memref<16x32xf32, #tpu.memory_space<vmem>>, vector<16x32xf32>
      %c0_39 = arith.constant 0 : index
      %c0_40 = arith.constant 0 : index
      %69 = vector.load %arg7[%c0_39, %c0_40] : memref<32x32xf32, #tpu.memory_space<vmem>>, vector<32x32xf32>
      %cst_41 = arith.constant dense<0.000000e+00> : vector<16x32xf32>
      %70 = tpu.matmul %68, %69, %cst_41 {dimension_numbers = #tpu.dot_dimension_numbers<[1], [0], [0], [1], [0, 0, 1, 1], [], []>} : vector<16x32xf32>, vector<32x32xf32>, vector<16x32xf32> -> vector<16x32xf32>
      %c0_42 = arith.constant 0 : index
      %c0_43 = arith.constant 0 : index
      %71 = vector.load %arg21[%c0_42, %c0_43] : memref<16x32xf32, #tpu.memory_space<vmem>>, vector<16x32xf32>
      tpu.vector_store %arg21[%c0_42, %c0_43], %70 {strides = array<i32>} : memref<16x32xf32, #tpu.memory_space<vmem>>, vector<16x32xf32>,
      %c0_44 = arith.constant 0 : index
      %c0_45 = arith.constant 0 : index
      %72 = vector.load %arg8[%c0_44, %c0_45] : memref<32x32xf32, #tpu.memory_space<vmem>>, vector<32x32xf32>
      %cst_46 = arith.constant dense<0.000000e+00> : vector<16x32xf32>
      %73 = tpu.matmul %68, %72, %cst_46 {dimension_numbers = #tpu.dot_dimension_numbers<[1], [0], [0], [1], [0, 0, 1, 1], [], []>} : vector<16x32xf32>, vector<32x32xf32>, vector<16x32xf32> -> vector<16x32xf32>
      %c0_47 = arith.constant 0 : index
      %c0_48 = arith.constant 0 : index
      %74 = vector.load %arg22[%c0_47, %c0_48] : memref<16x32xf32, #tpu.memory_space<vmem>>, vector<16x32xf32>
      tpu.vector_store %arg22[%c0_47, %c0_48], %73 {strides = array<i32>} : memref<16x32xf32, #tpu.memory_space<vmem>>, vector<16x32xf32>,
      %cst_49 = arith.constant 0.000000e+00 : f32
      %75 = vector.broadcast %cst_49 : f32 to vector<16x32xf32>
      %c0_50 = arith.constant 0 : index
      %c0_51 = arith.constant 0 : index
      %76 = vector.load %arg23[%c0_50, %c0_51] : memref<16x32xf32, #tpu.memory_space<vmem>>, vector<16x32xf32>
      tpu.vector_store %arg23[%c0_50, %c0_51], %75 {strides = array<i32>} : memref<16x32xf32, #tpu.memory_space<vmem>>, vector<16x32xf32>,
    } else {
    }
    %3 = tpu.iota {dimensions = array<i32: 0>} : vector<16x128xi32>
    %c0 = arith.constant 0 : index
    %c0_1 = arith.constant 0 : index
    %4 = vector.load %arg3[%c0, %c0_1] : memref<1x128xi32, #tpu.memory_space<vmem>>, vector<1x128xi32>
    %5 = vector.broadcast %4 : vector<1x128xi32> to vector<16x128xi32>
    %6 = arith.cmpi eq, %3, %5 : vector<16x128xi32>
    %7 = arith.extui %6 : vector<16x128xi1> to vector<16x128xi32>
    %8 = arith.sitofp %7 : vector<16x128xi32> to vector<16x128xf32>
    %c0_2 = arith.constant 0 : index
    %c0_3 = arith.constant 0 : index
    %9 = vector.load %arg4[%c0_2, %c0_3] : memref<1x128xi32, #tpu.memory_space<vmem>>, vector<1x128xi32>
    %10 = vector.broadcast %9 : vector<1x128xi32> to vector<16x128xi32>
    %11 = arith.cmpi eq, %3, %10 : vector<16x128xi32>
    %12 = arith.extui %11 : vector<16x128xi1> to vector<16x128xi32>
    %13 = arith.sitofp %12 : vector<16x128xi32> to vector<16x128xf32>
    %c0_4 = arith.constant 0 : index
    %c0_5 = arith.constant 0 : index
    %14 = vector.load %arg21[%c0_4, %c0_5] : memref<16x32xf32, #tpu.memory_space<vmem>>, vector<16x32xf32>
    %cst = arith.constant dense<0.000000e+00> : vector<128x32xf32>
    %15 = tpu.matmul %8, %14, %cst {dimension_numbers = #tpu.dot_dimension_numbers<[0], [0], [1], [1], [0, 1, 1, 1], [], []>} : vector<16x128xf32>, vector<16x32xf32>, vector<128x32xf32> -> vector<128x32xf32>
    %c0_6 = arith.constant 0 : index
    %c0_7 = arith.constant 0 : index
    %16 = vector.load %arg22[%c0_6, %c0_7] : memref<16x32xf32, #tpu.memory_space<vmem>>, vector<16x32xf32>
    %cst_8 = arith.constant dense<0.000000e+00> : vector<128x32xf32>
    %17 = tpu.matmul %13, %16, %cst_8 {dimension_numbers = #tpu.dot_dimension_numbers<[0], [0], [1], [1], [0, 1, 1, 1], [], []>} : vector<16x128xf32>, vector<16x32xf32>, vector<128x32xf32> -> vector<128x32xf32>
    %18 = arith.addf %15, %17 : vector<128x32xf32>
    %c0_9 = arith.constant 0 : index
    %c0_10 = arith.constant 0 : index
    %19 = vector.load %arg2[%c0_9, %c0_10] : memref<128x4xf32, #tpu.memory_space<vmem>>, vector<128x4xf32>
    %c0_11 = arith.constant 0 : index
    %c0_12 = arith.constant 0 : index
    %20 = vector.load %arg9[%c0_11, %c0_12] : memref<4x32xf32, #tpu.memory_space<vmem>>, vector<4x32xf32>
    %cst_13 = arith.constant dense<0.000000e+00> : vector<128x32xf32>
    %21 = tpu.matmul %19, %20, %cst_13 {dimension_numbers = #tpu.dot_dimension_numbers<[1], [0], [0], [1], [0, 0, 1, 1], [], []>} : vector<128x4xf32>, vector<4x32xf32>, vector<128x32xf32> -> vector<128x32xf32>
    %22 = arith.addf %18, %21 : vector<128x32xf32>
    %c0_14 = arith.constant 0 : index
    %c0_15 = arith.constant 0 : index
    %23 = vector.load %arg10[%c0_14, %c0_15] : memref<1x32xf32, #tpu.memory_space<vmem>>, vector<1x32xf32>
    %24 = vector.broadcast %23 : vector<1x32xf32> to vector<128x32xf32>
    %25 = arith.addf %22, %24 : vector<128x32xf32>
    %26 = arith.negf %25 : vector<128x32xf32>
    %27 = math.exp %26 : vector<128x32xf32>
    %cst_16 = arith.constant 1.000000e+00 : f32
    %28 = vector.broadcast %cst_16 : f32 to vector<128x32xf32>
    %29 = arith.addf %28, %27 : vector<128x32xf32>
    %30 = arith.divf %28, %29 : vector<128x32xf32>
    %31 = arith.mulf %25, %30 : vector<128x32xf32>
    %c0_17 = arith.constant 0 : index
    %c0_18 = arith.constant 0 : index
    %32 = vector.load %arg11[%c0_17, %c0_18] : memref<32x32xf32, #tpu.memory_space<vmem>>, vector<32x32xf32>
    %cst_19 = arith.constant dense<0.000000e+00> : vector<128x32xf32>
    %33 = tpu.matmul %31, %32, %cst_19 {dimension_numbers = #tpu.dot_dimension_numbers<[1], [0], [0], [1], [0, 0, 1, 1], [], []>} : vector<128x32xf32>, vector<32x32xf32>, vector<128x32xf32> -> vector<128x32xf32>
    %c0_20 = arith.constant 0 : index
    %c0_21 = arith.constant 0 : index
    %34 = vector.load %arg12[%c0_20, %c0_21] : memref<1x32xf32, #tpu.memory_space<vmem>>, vector<1x32xf32>
    %35 = vector.broadcast %34 : vector<1x32xf32> to vector<128x32xf32>
    %36 = arith.addf %33, %35 : vector<128x32xf32>
    %37 = arith.negf %36 : vector<128x32xf32>
    %38 = math.exp %37 : vector<128x32xf32>
    %cst_22 = arith.constant 1.000000e+00 : f32
    %39 = vector.broadcast %cst_22 : f32 to vector<128x32xf32>
    %40 = arith.addf %39, %38 : vector<128x32xf32>
    %41 = arith.divf %39, %40 : vector<128x32xf32>
    %42 = arith.mulf %36, %41 : vector<128x32xf32>
    %c0_23 = arith.constant 0 : index
    %c0_24 = arith.constant 0 : index
    %43 = vector.load %arg13[%c0_23, %c0_24] : memref<1x32xf32, #tpu.memory_space<vmem>>, vector<1x32xf32>
    %44 = vector.broadcast %43 : vector<1x32xf32> to vector<128x32xf32>
    %45 = arith.mulf %42, %44 : vector<128x32xf32>
    %cst_25 = arith.constant dense<0.000000e+00> : vector<128xf32>
    %46 = vector.multi_reduction <add>, %45, %cst_25 [1] : vector<128x32xf32> to vector<128xf32>
    %47 = vector.shape_cast %46 : vector<128xf32> to vector<128x1xf32>
    %c0_26 = arith.constant 0 : index
    %c0_27 = arith.constant 0 : index
    %48 = vector.load %arg14[%c0_26, %c0_27] : memref<1x1xf32, #tpu.memory_space<vmem>>, vector<1x1xf32>
    %49 = vector.broadcast %48 : vector<1x1xf32> to vector<128x1xf32>
    %50 = arith.addf %47, %49 : vector<128x1xf32>
    %51 = arith.negf %50 : vector<128x1xf32>
    %52 = math.exp %51 : vector<128x1xf32>
    %cst_28 = arith.constant 1.000000e+00 : f32
    %53 = vector.broadcast %cst_28 : f32 to vector<128x1xf32>
    %54 = arith.addf %53, %52 : vector<128x1xf32>
    %55 = arith.divf %53, %54 : vector<128x1xf32>
    %56 = vector.broadcast %55 : vector<128x1xf32> to vector<128x32xf32>
    %57 = arith.mulf %42, %56 : vector<128x32xf32>
    %c0_29 = arith.constant 0 : index
    %c0_30 = arith.constant 0 : index
    %58 = vector.load %arg5[%c0_29, %c0_30] : memref<1x128xf32, #tpu.memory_space<vmem>>, vector<1x128xf32>
    %59 = vector.broadcast %58 : vector<1x128xf32> to vector<16x128xf32>
    %60 = arith.mulf %8, %59 : vector<16x128xf32>
    %c0_31 = arith.constant 0 : index
    %c0_32 = arith.constant 0 : index
    %61 = vector.load %arg23[%c0_31, %c0_32] : memref<16x32xf32, #tpu.memory_space<vmem>>, vector<16x32xf32>
    %cst_33 = arith.constant dense<0.000000e+00> : vector<16x32xf32>
    %62 = tpu.matmul %60, %57, %cst_33 {dimension_numbers = #tpu.dot_dimension_numbers<[1], [0], [0], [1], [0, 0, 1, 1], [], []>} : vector<16x128xf32>, vector<128x32xf32>, vector<16x32xf32> -> vector<16x32xf32>
    %63 = arith.addf %61, %62 : vector<16x32xf32>
    %c0_34 = arith.constant 0 : index
    %c0_35 = arith.constant 0 : index
    %64 = vector.load %arg23[%c0_34, %c0_35] : memref<16x32xf32, #tpu.memory_space<vmem>>, vector<16x32xf32>
    tpu.vector_store %arg23[%c0_34, %c0_35], %63 {strides = array<i32>} : memref<16x32xf32, #tpu.memory_space<vmem>>, vector<16x32xf32>,
    %c1_i32 = arith.constant 1 : i32
    %65 = arith.cmpi eq, %arg0, %c1_i32 : i32
    %66 = arith.extui %65 : i1 to i32
    %c0_i32_36 = arith.constant 0 : i32
    %67 = arith.cmpi ne, %66, %c0_i32_36 : i32
    scf.if %67 {
      %c0_37 = arith.constant 0 : index
      %c0_38 = arith.constant 0 : index
      %68 = vector.load %arg1[%c0_37, %c0_38] : memref<16x32xf32, #tpu.memory_space<vmem>>, vector<16x32xf32>
      %c0_39 = arith.constant 0 : index
      %c0_40 = arith.constant 0 : index
      %69 = vector.load %arg15[%c0_39, %c0_40] : memref<32x32xf32, #tpu.memory_space<vmem>>, vector<32x32xf32>
      %cst_41 = arith.constant dense<0.000000e+00> : vector<16x32xf32>
      %70 = tpu.matmul %68, %69, %cst_41 {dimension_numbers = #tpu.dot_dimension_numbers<[1], [0], [0], [1], [0, 0, 1, 1], [], []>} : vector<16x32xf32>, vector<32x32xf32>, vector<16x32xf32> -> vector<16x32xf32>
      %c0_42 = arith.constant 0 : index
      %c0_43 = arith.constant 0 : index
      %71 = vector.load %arg23[%c0_42, %c0_43] : memref<16x32xf32, #tpu.memory_space<vmem>>, vector<16x32xf32>
      %c0_44 = arith.constant 0 : index
      %c0_45 = arith.constant 0 : index
      %72 = vector.load %arg16[%c0_44, %c0_45] : memref<32x32xf32, #tpu.memory_space<vmem>>, vector<32x32xf32>
      %cst_46 = arith.constant dense<0.000000e+00> : vector<16x32xf32>
      %73 = tpu.matmul %71, %72, %cst_46 {dimension_numbers = #tpu.dot_dimension_numbers<[1], [0], [0], [1], [0, 0, 1, 1], [], []>} : vector<16x32xf32>, vector<32x32xf32>, vector<16x32xf32> -> vector<16x32xf32>
      %74 = arith.addf %70, %73 : vector<16x32xf32>
      %c0_47 = arith.constant 0 : index
      %c0_48 = arith.constant 0 : index
      %75 = vector.load %arg17[%c0_47, %c0_48] : memref<1x32xf32, #tpu.memory_space<vmem>>, vector<1x32xf32>
      %76 = vector.broadcast %75 : vector<1x32xf32> to vector<16x32xf32>
      %77 = arith.addf %74, %76 : vector<16x32xf32>
      %78 = arith.negf %77 : vector<16x32xf32>
      %79 = math.exp %78 : vector<16x32xf32>
      %cst_49 = arith.constant 1.000000e+00 : f32
      %80 = vector.broadcast %cst_49 : f32 to vector<16x32xf32>
      %81 = arith.addf %80, %79 : vector<16x32xf32>
      %82 = arith.divf %80, %81 : vector<16x32xf32>
      %83 = arith.mulf %77, %82 : vector<16x32xf32>
      %c0_50 = arith.constant 0 : index
      %c0_51 = arith.constant 0 : index
      %84 = vector.load %arg18[%c0_50, %c0_51] : memref<32x32xf32, #tpu.memory_space<vmem>>, vector<32x32xf32>
      %cst_52 = arith.constant dense<0.000000e+00> : vector<16x32xf32>
      %85 = tpu.matmul %83, %84, %cst_52 {dimension_numbers = #tpu.dot_dimension_numbers<[1], [0], [0], [1], [0, 0, 1, 1], [], []>} : vector<16x32xf32>, vector<32x32xf32>, vector<16x32xf32> -> vector<16x32xf32>
      %c0_53 = arith.constant 0 : index
      %c0_54 = arith.constant 0 : index
      %86 = vector.load %arg19[%c0_53, %c0_54] : memref<1x32xf32, #tpu.memory_space<vmem>>, vector<1x32xf32>
      %87 = vector.broadcast %86 : vector<1x32xf32> to vector<16x32xf32>
      %88 = arith.addf %85, %87 : vector<16x32xf32>
      %89 = arith.addf %68, %88 : vector<16x32xf32>
      %c0_55 = arith.constant 0 : index
      %c0_56 = arith.constant 0 : index
      %90 = vector.load %arg6[%c0_55, %c0_56] : memref<16x1xf32, #tpu.memory_space<vmem>>, vector<16x1xf32>
      %91 = vector.broadcast %90 : vector<16x1xf32> to vector<16x32xf32>
      %92 = arith.mulf %89, %91 : vector<16x32xf32>
      %c0_57 = arith.constant 0 : index
      %c0_58 = arith.constant 0 : index
      %93 = vector.load %arg20[%c0_57, %c0_58] : memref<16x32xf32, #tpu.memory_space<vmem>>, vector<16x32xf32>
      tpu.vector_store %arg20[%c0_57, %c0_58], %92 {strides = array<i32>} : memref<16x32xf32, #tpu.memory_space<vmem>>, vector<16x32xf32>,
    } else {
    }
    return
  }
  func.func @transform_0(%arg0: i32) -> (i32, i32) {
    %c0_i32 = arith.constant 0 : i32
    %c0_i32_0 = arith.constant 0 : i32
    %c0_i32_1 = arith.constant 0 : i32
    return %c0_i32, %c0_i32_0 : i32, i32
  }
  func.func @transform_1(%arg0: i32) -> (i32, i32) {
    %c0_i32 = arith.constant 0 : i32
    %c0_i32_0 = arith.constant 0 : i32
    return %arg0, %c0_i32 : i32, i32
  }
  func.func @transform_2(%arg0: i32) -> (i32, i32) {
    %c0_i32 = arith.constant 0 : i32
    %c0_i32_0 = arith.constant 0 : i32
    return %c0_i32, %arg0 : i32, i32
  }
  func.func @transform_3(%arg0: i32) -> (i32, i32) {
    %c0_i32 = arith.constant 0 : i32
    %c0_i32_0 = arith.constant 0 : i32
    return %c0_i32, %arg0 : i32, i32
  }
  func.func @transform_4(%arg0: i32) -> (i32, i32) {
    %c0_i32 = arith.constant 0 : i32
    %c0_i32_0 = arith.constant 0 : i32
    return %c0_i32, %arg0 : i32, i32
  }
  func.func @transform_5(%arg0: i32) -> (i32, i32) {
    %c0_i32 = arith.constant 0 : i32
    %c0_i32_0 = arith.constant 0 : i32
    %c0_i32_1 = arith.constant 0 : i32
    return %c0_i32, %c0_i32_0 : i32, i32
  }
  func.func @transform_6(%arg0: i32) -> (i32, i32) {
    %c0_i32 = arith.constant 0 : i32
    %c0_i32_0 = arith.constant 0 : i32
    %c0_i32_1 = arith.constant 0 : i32
    return %c0_i32, %c0_i32_0 : i32, i32
  }
  func.func @transform_7(%arg0: i32) -> (i32, i32) {
    %c0_i32 = arith.constant 0 : i32
    %c0_i32_0 = arith.constant 0 : i32
    %c0_i32_1 = arith.constant 0 : i32
    return %c0_i32, %c0_i32_0 : i32, i32
  }
  func.func @transform_8(%arg0: i32) -> (i32, i32) {
    %c0_i32 = arith.constant 0 : i32
    %c0_i32_0 = arith.constant 0 : i32
    %c0_i32_1 = arith.constant 0 : i32
    return %c0_i32, %c0_i32_0 : i32, i32
  }
  func.func @transform_9(%arg0: i32) -> (i32, i32) {
    %c0_i32 = arith.constant 0 : i32
    %c0_i32_0 = arith.constant 0 : i32
    %c0_i32_1 = arith.constant 0 : i32
    return %c0_i32, %c0_i32_0 : i32, i32
  }
  func.func @transform_10(%arg0: i32) -> (i32, i32) {
    %c0_i32 = arith.constant 0 : i32
    %c0_i32_0 = arith.constant 0 : i32
    %c0_i32_1 = arith.constant 0 : i32
    return %c0_i32, %c0_i32_0 : i32, i32
  }
  func.func @transform_11(%arg0: i32) -> (i32, i32) {
    %c0_i32 = arith.constant 0 : i32
    %c0_i32_0 = arith.constant 0 : i32
    %c0_i32_1 = arith.constant 0 : i32
    return %c0_i32, %c0_i32_0 : i32, i32
  }
  func.func @transform_12(%arg0: i32) -> (i32, i32) {
    %c0_i32 = arith.constant 0 : i32
    %c0_i32_0 = arith.constant 0 : i32
    %c0_i32_1 = arith.constant 0 : i32
    return %c0_i32, %c0_i32_0 : i32, i32
  }
  func.func @transform_13(%arg0: i32) -> (i32, i32) {
    %c0_i32 = arith.constant 0 : i32
    %c0_i32_0 = arith.constant 0 : i32
    %c0_i32_1 = arith.constant 0 : i32
    return %c0_i32, %c0_i32_0 : i32, i32
  }
  func.func @transform_14(%arg0: i32) -> (i32, i32) {
    %c0_i32 = arith.constant 0 : i32
    %c0_i32_0 = arith.constant 0 : i32
    %c0_i32_1 = arith.constant 0 : i32
    return %c0_i32, %c0_i32_0 : i32, i32
  }
  func.func @transform_15(%arg0: i32) -> (i32, i32) {
    %c0_i32 = arith.constant 0 : i32
    %c0_i32_0 = arith.constant 0 : i32
    %c0_i32_1 = arith.constant 0 : i32
    return %c0_i32, %c0_i32_0 : i32, i32
  }
  func.func @transform_16(%arg0: i32) -> (i32, i32) {
    %c0_i32 = arith.constant 0 : i32
    %c0_i32_0 = arith.constant 0 : i32
    %c0_i32_1 = arith.constant 0 : i32
    return %c0_i32, %c0_i32_0 : i32, i32
  }
  func.func @transform_17(%arg0: i32) -> (i32, i32) {
    %c0_i32 = arith.constant 0 : i32
    %c0_i32_0 = arith.constant 0 : i32
    %c0_i32_1 = arith.constant 0 : i32
    return %c0_i32, %c0_i32_0 : i32, i32
  }
  func.func @transform_18(%arg0: i32) -> (i32, i32) {
    %c0_i32 = arith.constant 0 : i32
    %c0_i32_0 = arith.constant 0 : i32
    %c0_i32_1 = arith.constant 0 : i32
    return %c0_i32, %c0_i32_0 : i32, i32
  }
  func.func @transform_19(%arg0: i32) -> (i32, i32) {
    %c0_i32 = arith.constant 0 : i32
    %c0_i32_0 = arith.constant 0 : i32
    %c0_i32_1 = arith.constant 0 : i32
    return %c0_i32, %c0_i32_0 : i32, i32
  }
}

</mosaic_0001>

<bundles_post_ra>
// kernel: tpu_custom_call.1
= control target key start
LH: loop header
LB: loop body
LE: loop exit
PB: predicated region body
PF: predicated region fallthrough
CT: control target
= control target key end

     0   :  { %s4266_s0 = inlined_call_operand.vmem [shape: f32[16,32], index: 0, kind: input, shape index: {}]   ;;  %s4267_s1 = inlined_call_operand.vmem [shape: f32[256,4], index: 1, kind: input, shape index: {}]   ;;  %s4268_s2 = inlined_call_operand.vmem [shape: s32[1,256], index: 2, kind: input, shape index: {}]   ;;  %s4269_s3 = inlined_call_operand.vmem [shape: s32[1,256], index: 3, kind: input, shape index: {}]   ;;  %s4270_s4 = inlined_call_operand.vmem [shape: f32[1,256], index: 4, kind: input, shape index: {}]   ;;  %s4271_s5 = inlined_call_operand.vmem [shape: f32[16,1], index: 5, kind: input, shape index: {}]   ;;  %s4272_s6 = inlined_call_operand.vmem [shape: f32[32,32], index: 6, kind: input, shape index: {}]   ;;  %s4273_s7 = inlined_call_operand.vmem [shape: f32[32,32], index: 7, kind: input, shape index: {}]   ;;  %s4274_s8 = inlined_call_operand.vmem [shape: f32[4,32], index: 8, kind: input, shape index: {}]   ;;  %s4275_s9 = inlined_call_operand.vmem [shape: f32[1,32], index: 9, kind: input, shape index: {}]   ;;  %s4276_s10 = inlined_call_operand.vmem [shape: f32[32,32], index: 10, kind: input, shape index: {}]   ;;  %s4277_s11 = inlined_call_operand.vmem [shape: f32[1,32], index: 11, kind: input, shape index: {}]   ;;  %s4278_s12 = inlined_call_operand.vmem [shape: f32[1,32], index: 12, kind: input, shape index: {}]   ;;  %s4279_s13 = inlined_call_operand.<no memory space> [shape: f32[1,1], index: 13, kind: input, shape index: {}]   ;;  %s4280_s14 = inlined_call_operand.vmem [shape: f32[32,32], index: 14, kind: input, shape index: {}]   ;;  %s4281_s15 = inlined_call_operand.vmem [shape: f32[32,32], index: 15, kind: input, shape index: {}]   ;;  %s4282_s16 = inlined_call_operand.vmem [shape: f32[1,32], index: 16, kind: input, shape index: {}]   ;;  %s4283_s17 = inlined_call_operand.vmem [shape: f32[32,32], index: 17, kind: input, shape index: {}]   ;;  %s4284_s18 = inlined_call_operand.vmem [shape: f32[1,32], index: 18, kind: input, shape index: {}]   ;;  %s4285_s19 = inlined_call_operand.hbm [shape: f32[16,32], index: 19, kind: output, shape index: {}]  }
   0x1   :  { %4290 = sst [smem:[#allocation10_spill]] %s4266_s0  ;;  %v24_v0 = vstv %s4279_s13 }
   0x2   :  { %4291 = sst [smem:[#allocation11_spill]] %s4267_s1  ;;  %25 = vst [vmem:[#allocation5] sm:$0x1] %v24_v0 }
   0x3   :  { %4292 = sst [smem:[#allocation12_spill]] %s4268_s2 }
   0x4   :  { %4293 = sst [smem:[#allocation13_spill]] %s4269_s3 }
   0x5   :  { %4294 = sst [smem:[#allocation14_spill]] %s4271_s5 }
   0x6   :  { %4295 = sst [smem:[#allocation15_spill]] %s4282_s16 }
   0x7   :  { %4296 = sst [smem:[#allocation16_spill]] %s4284_s18 }
   0x8   :  { %4297 = sst [smem:[#allocation17_spill]] %s4285_s19 }
   0x9   :  { %26 = vsyncpa [#allocation7], 0  ;;  %s3666_s20 = smov 0  }
   0xa LB: > { %4298 = sst [smem:[#allocation9_spill]] %s3554_s20  ;;  %s3672_s21 = sadd.s32 4294967295, %s3554_s20   ;;  %s3554_s20 = sphi %s3666_s20, %s32_s20  }
   0xb   : > { %p2740_p0 = scmp.ge.s32.totalorder %s3554_s20, 1  ;;  %p560_p1 = scmp.lt.s32.totalorder %s3554_s20, 3 }
   0xd   : > { %p561_p2 = pnand %p2740_p0, %p560_p1 }
   0xe   : > { %s2741_s13 = sshll.u32 (!%p561_p2), %s3672_s21, 4  ;;  %p626_p3 = scmp.lt.s32.totalorder (!%p561_p2), %s3672_s21, 1 }
   0xf   : > { %564 = sbr.rel (%p561_p2) target bundleno = 1950 (0x79e), region = 96  ;;  %p621_p4 = scmp.lt.s32.totalorder (!%p561_p2), %s2741_s13, 31 }
  0x10   : > { %s4299_s23 = sld [smem:[#allocation12_spill]] (!%p561_p2)  ;;  %p2743_p5 = scmp.ne.s32.totalorder (!%p561_p2), %s3672_s21, 0 }
  0x11   : > { %s4300_s26 = sld [smem:[#allocation13_spill]] (!%p561_p2) }
  0x12   : > { %s4301_s18 = sld [smem:[#allocation11_spill]] (!%p561_p2) }
  0x14   : > { %s3679_s1 = scalar_select %p626_p3, %s3672_s21, 1 }
  0x15   : > { %s4312_s13 = smov (!%p621_p4, %s2741_s13), 31  ;;  %638 = sbr.rel (%p2743_p5) target bundleno = 233 (0xe9), region = 100 }
  0x16   : > { %s628_s24 = scalar_lea.vmem %s4299_s23, %s3679_s1  ;;  %s2742_s28 = sshll.u32 %s4312_s13, 3 }
  0x17   : > { %s631_s27 = scalar_lea.vmem %s4300_s26, %s3679_s1  ;;  %s634_s30 = scalar_lea.vmem %s4270_s4, %s3679_s1 }
  0x18   : > { %s3696_s16 = scalar_lea.vmem %s4301_s18, %s2742_s28  ;;  %s4302_s13 = sld [smem:[#allocation10_spill]] (!%p2743_p5) }
  0x1a   : > { %v644_v1 = vld [vmem:[%s4272_s6 + $0x18] sm:$0xff]  ;;  %v643_v3 = vld [vmem:[%s4272_s6 + $0x10] sm:$0xff]  ;;  %vm645_vm0 = vcmask 261120   ;;  %v3556_v5 = vmov 0.0   ;;  %v642_v6 = vld [vmem:[%s4272_s6 + $0x8] sm:$0xff] }
  0x1b   : > { %v732_v2 = vld [vmem:[%s4273_s7 + $0x18] sm:$0xff]  ;;  %3008 = vmatprep.subr.mxu0 %v644_v1  ;;  %v731_v4 = vld [vmem:[%s4273_s7 + $0x10] sm:$0xff]  ;;  %810 = vst.msk [vmem:[#allocation4] sm:$0xff] %vm645_vm0, %v3556_v5  ;;  %811 = vst.msk [vmem:[#allocation4 + $0x8] sm:$0xff] %vm645_vm0, %v3556_v5 }
  0x1c   : > { %3019 = vmatprep.subr.mxu1 %v732_v2  ;;  %3009 = vmatpush3.msra.mxu0 %v644_v1  ;;  %v730_v7 = vld [vmem:[%s4273_s7 + $0x8] sm:$0xff]  ;;  %v641_v8 = vld [vmem:[%s4272_s6] sm:$0xff] }
  0x1d   : > { %3020 = vmatpush3.msra.mxu1 %v732_v2  ;;  %3010 = vmatprep.subr.mxu0 %v643_v3  ;;  %v729_v9 = vld [vmem:[%s4273_s7] sm:$0xff] }
  0x1e   : > { %3021 = vmatprep.subr.mxu1 %v731_v4  ;;  %3011 = vmatpush3.msra.mxu0 %v643_v3  ;;  %v639_v10 = vld [vmem:[%s4302_s13] sm:$0xff]  ;;  %v640_v11 = vld [vmem:[%s4302_s13 + $0x8] sm:$0xff] }
  0x1f   : > { %3022 = vmatpush3.msra.mxu1 %v731_v4  ;;  %3012 = vmatprep.subr.mxu0 %v642_v6 }
  0x20   : > { %3023 = vmatprep.subr.mxu1 %v730_v7  ;;  %3013 = vmatpush3.msra.mxu0 %v642_v6 }
  0x21   : > { %3024 = vmatpush3.msra.mxu1 %v730_v7  ;;  %3014 = vmatprep.subr.mxu0 %v641_v8 }
  0x22   : > { %3025 = vmatprep.subr.mxu1 %v729_v9  ;;  %3015 = vmatpush3.msra.mxu0 %v641_v8 }
  0x23   : > { %3016 = vmatprep.mubr.msk.f32.mxu0 %vm645_vm0, %v639_v10  ;;  %3026 = vmatpush3.msra.mxu1 %v729_v9 }
  0x24   : > { %3027 = vmatprep.mubr.msk.f32.mxu1 %vm645_vm0, %v639_v10  ;;  %3017 = vmatmul.mubr.msk.f32.vlgmr.msra.gmra.mxu0 %vm645_vm0, %v640_v11 }
  0x25   : > { %3028 = vmatmul.mubr.msk.f32.vlgmr.msra.gmra.mxu1 %vm645_vm0, %v640_v11 }
  0xe4   : > { %v3018_v12 = vpop.f32.mrf.mxu0 }
  0xe5   : > { %v3029_v13 = vpop.f32.mrf.mxu1  ;;  %728 = vst.msk [vmem:[#allocation2 + $0x8] sm:$0xff] %vm645_vm0, %v3018_v12 }
  0xe6   : > { %809 = vst.msk [vmem:[#allocation3 + $0x8] sm:$0xff] %vm645_vm0, %v3029_v13  ;;  %v718_v14 = vpop.f32.mrf.mxu0 }
  0xe7   : > { %v799_v15 = vpop.f32.mrf.mxu1  ;;  %727 = vst.msk [vmem:[#allocation2] sm:$0xff] %vm645_vm0, %v718_v14 }
  0xe8   : > { %808 = vst.msk [vmem:[#allocation3] sm:$0xff] %vm645_vm0, %v799_v15 }
  0xe9 PF: > { %v812_v16 = vlaneseq  ;;  %v2748_v17 = vld [vmem:[%s628_s24] ss:$0 sm:$0xff]  ;;  %v3557_v21 = vmov 0.0   ;;  %vm1358_vm5 = vcmask 1043456   ;;  %vm873_vm6 = vcmask 130048   ;;  %p2872_p6 = scmp.ne.s32.totalorder %s3672_s21, 1 }
  0xea   : > { %v2751_v18 = vld [vmem:[%s631_s27] ss:$0 sm:$0xff]  ;;  %vm1309_vm7 = vcmask 31744   ;;  %vm1669_vm8 = vcmask 261120   ;;  %s4305_s26 = sld [smem:[#allocation10_spill]] (!%p2872_p6) }
  0xeb   : > { %v813_v19 = vshrl.u32 %v812_v16, 7  ;;  %v3756_v24 = vld [vmem:[%s634_s30] ss:$0 sm:$0xff]  ;;  %s4306_s25 = sld [smem:[#allocation14_spill]] (!%p2872_p6) }
  0xec   : > { %v838_v27 = vld [vmem:[#allocation2 + $0x8] sm:$0xff]  ;;  %v1308_v34 = vld [vmem:[%s4274_s8] sm:$0xf]  ;;  %s4307_s3 = sld [smem:[#allocation15_spill]] (!%p2872_p6) }
  0xed   : > { %vm820_vm1 = vcmp.eq.s32.totalorder %v813_v19, %v2748_v17  ;;  %vm831_vm2 = vcmp.eq.s32.totalorder %v813_v19, %v2751_v18  ;;  %v814_v20 = vadd.s32 8, %v813_v19  ;;  %v840_v25 = vld [vmem:[#allocation3 + $0x8] sm:$0xff]  ;;  %3058 = vmatprep.subr.mxu1 %v838_v27  ;;  %v1292_v19 = vld [vmem:[%s3696_s16] sm:$0xff]  ;;  %s4308_s29 = sld [smem:[#allocation16_spill]] (!%p2872_p6) }
  0xee   : > { %v3749_v22 = vsel %vm820_vm1, 1.0, %v3557_v21  ;;  %v2752_v23 = vsel %vm831_vm2, 1.0, %v3557_v21  ;;  %3030 = vmatprep.subr.mxu0 %v840_v25  ;;  %3059 = vmatpush3.msra.mxu1 %v838_v27  ;;  %v837_v33 = vld [vmem:[#allocation2] sm:$0xff]  ;;  %v1298_v27 = vld [vmem:[%s3696_s16 + $0x30] sm:$0xff] }
  0xef   : > { %v3233_v26 = vpack.i.bf16 %v3749_v22, %v2752_v23  ;;  %vm821_vm3 = vcmp.eq.s32.totalorder %v814_v20, %v2748_v17  ;;  %vm832_vm4 = vcmp.eq.s32.totalorder %v814_v20, %v2751_v18  ;;  %3031 = vmatpush3.msra.mxu0 %v840_v25  ;;  %v839_v32 = vld [vmem:[#allocation3] sm:$0xff]  ;;  %3060 = vmatprep.subr.mxu1 %v837_v33  ;;  %v1293_v20 = vld [vmem:[%s3696_s16 + $0x8] sm:$0xff]  ;;  %v1295_v23 = vld [vmem:[%s3696_s16 + $0x18] sm:$0xff] }
  0xf0   : > { %v2750_v28 = vsel %vm821_vm3, 1.0, %v3557_v21  ;;  %v2753_v29 = vsel %vm832_vm4, 1.0, %v3557_v21  ;;  %3032 = vmatprep.subr.mxu0 %v839_v32  ;;  %3061 = vmatpush3.msra.mxu1 %v837_v33  ;;  %v1294_v21 = vld [vmem:[%s3696_s16 + $0x10] sm:$0xff]  ;;  %v1296_v25 = vld [vmem:[%s3696_s16 + $0x20] sm:$0xff]  ;;  %v1303_v33 = vld [vmem:[%s3696_s16 + $0x58] sm:$0xff] }
  0xf1   : > { %3234 = vxpose.xlu0.b32.start [1/2] (short) %v3233_v26, 128  ;;  %v3235_v30 = vpack.i.bf16 %v2750_v28, %v2753_v29  ;;  %v3760_v31 = vmul.f32 %v3756_v24, %v2750_v28  ;;  %3033 = vmatpush3.msra.mxu0 %v839_v32  ;;  %v1297_v26 = vld [vmem:[%s3696_s16 + $0x28] sm:$0xff]  ;;  %v1299_v28 = vld [vmem:[%s3696_s16 + $0x38] sm:$0xff]  ;;  %v1300_v29 = vld [vmem:[%s3696_s16 + $0x40] sm:$0xff] }
  0xf2   : > { %3086 = vmatprep.subr.msk.mxu0 %vm1358_vm5, %v1308_v34  ;;  %v1302_v32 = vld [vmem:[%s3696_s16 + $0x50] sm:$0xff] }
  0xf5   : > { %3236 = vxpose.xlu0.b32.end [2/2] (short) %v3235_v30, 128  ;;  %v1301_v30 = vld [vmem:[%s3696_s16 + $0x48] sm:$0xff] }
 0x16d   : > { %v3237_v35 = vpop.trf.xlu0 }
 0x16e   : > { %v3238_v36 = vunpack.i.l.bf16 %v3237_v35  ;;  %v3241_v37 = vunpack.i.h.bf16 %v3237_v35  ;;  %v1305_v35 = vld [vmem:[%s3696_s16 + $0x68] sm:$0xff] }
 0x170   : > { %3034 = vmatprep.mubr.msk.f32.mxu0 %vm873_vm6, %v3238_v36  ;;  %3062 = vmatprep.mubr.msk.f32.mxu1 %vm873_vm6, %v3241_v37  ;;  %v1306_v36 = vld [vmem:[%s3696_s16 + $0x70] sm:$0xff]  ;;  %v2268_v37 = vmul.f32 %v3756_v24, %v3749_v22  ;;  %v1659_v22 = vld [vmem:[%s4276_s10 + $0x8] sm:$0xff]  ;;  %v1658_v24 = vld [vmem:[%s4276_s10] sm:$0xff] }
 0x171   : > { %v3242_v38 = vpop.trf.xlu0 }
 0x172   : > { %v3246_v39 = vunpack.i.h.bf16 %v3242_v38  ;;  %v3243_v40 = vunpack.i.l.bf16 %v3242_v38  ;;  %v1307_v38 = vld [vmem:[%s3696_s16 + $0x78] sm:$0xff] }
 0x174   : > { %3035 = vmatmul.mubr.msk.f32.vlgmr.msra.gmra.mxu0 %vm873_vm6, %v3243_v40  ;;  %3063 = vmatmul.mubr.msk.f32.vlgmr.msra.gmra.mxu1 %vm873_vm6, %v3246_v39  ;;  %v1661_v39 = vld [vmem:[%s4276_s10 + $0x18] sm:$0xff]  ;;  %v1660_v40 = vld [vmem:[%s4276_s10 + $0x10] sm:$0xff] }
 0x175   : > { %v3247_v41 = vpop.trf.xlu0  ;;  %3087 = vmatpush3.msk.msra.mxu0 %vm1358_vm5, %v1308_v34  ;;  %v1304_v34 = vld [vmem:[%s3696_s16 + $0x60] sm:$0xff]  ;;  %3112 = vmatprep.subr.mxu1 %v1661_v39 }
 0x176   : > { %v3251_v42 = vunpack.i.h.bf16 %v3247_v41  ;;  %v3248_v43 = vunpack.i.l.bf16 %v3247_v41  ;;  %3113 = vmatpush3.msra.mxu1 %v1661_v39 }
 0x177   : > { %3114 = vmatprep.subr.mxu1 %v1660_v40 }
 0x178   : > { %3037 = vmatprep.mubr.msk.f32.mxu0 %vm873_vm6, %v3248_v43  ;;  %3065 = vmatprep.mubr.msk.f32.mxu1 %vm873_vm6, %v3251_v42 }
 0x179   : > { %v3252_v44 = vpop.trf.xlu0  ;;  %3115 = vmatpush3.msra.mxu1 %v1660_v40 }
 0x17a   : > { %v3256_v45 = vunpack.i.h.bf16 %v3252_v44  ;;  %v3253_v46 = vunpack.i.l.bf16 %v3252_v44  ;;  %3116 = vmatprep.subr.mxu1 %v1659_v22 }
 0x17b   : > { %3117 = vmatpush3.msra.mxu1 %v1659_v22 }
 0x17c   : > { %3038 = vmatmul.mubr.msk.f32.gmra.mxu0 %vm873_vm6, %v3253_v46  ;;  %3066 = vmatmul.mubr.msk.f32.gmra.mxu1 %vm873_vm6, %v3256_v45 }
 0x17d   : > { %v3257_v47 = vpop.trf.xlu0  ;;  %3118 = vmatprep.subr.mxu1 %v1658_v24 }
 0x17e   : > { %v3261_v48 = vunpack.i.h.bf16 %v3257_v47  ;;  %v3258_v49 = vunpack.i.l.bf16 %v3257_v47  ;;  %3119 = vmatpush3.msra.mxu1 %v1658_v24 }
 0x180   : > { %3040 = vmatprep.mubr.msk.f32.mxu0 %vm873_vm6, %v3258_v49  ;;  %3068 = vmatprep.mubr.msk.f32.mxu1 %vm873_vm6, %v3261_v48 }
 0x181   : > { %v3262_v50 = vpop.trf.xlu0 }
 0x182   : > { %v3266_v51 = vunpack.i.h.bf16 %v3262_v50  ;;  %v3263_v52 = vunpack.i.l.bf16 %v3262_v50 }
 0x184   : > { %3041 = vmatmul.mubr.msk.f32.gmra.mxu0 %vm873_vm6, %v3263_v52  ;;  %3069 = vmatmul.mubr.msk.f32.gmra.mxu1 %vm873_vm6, %v3266_v51 }
 0x185   : > { %v3267_v53 = vpop.trf.xlu0 }
 0x186   : > { %v3271_v54 = vunpack.i.h.bf16 %v3267_v53  ;;  %v3268_v55 = vunpack.i.l.bf16 %v3267_v53 }
 0x188   : > { %3043 = vmatprep.mubr.msk.f32.mxu0 %vm873_vm6, %v3268_v55  ;;  %3071 = vmatprep.mubr.msk.f32.mxu1 %vm873_vm6, %v3271_v54 }
 0x189   : > { %v3272_v56 = vpop.trf.xlu0 }
 0x18a   : > { %v3276_v57 = vunpack.i.h.bf16 %v3272_v56  ;;  %v3273_v58 = vunpack.i.l.bf16 %v3272_v56 }
 0x18c   : > { %3044 = vmatmul.mubr.msk.f32.gmra.mxu0 %vm873_vm6, %v3273_v58  ;;  %3072 = vmatmul.mubr.msk.f32.gmra.mxu1 %vm873_vm6, %v3276_v57 }
 0x18d   : > { %v3277_v59 = vpop.trf.xlu0 }
 0x18e   : > { %v3281_v60 = vunpack.i.h.bf16 %v3277_v59  ;;  %v3278_v61 = vunpack.i.l.bf16 %v3277_v59 }
 0x190   : > { %3046 = vmatprep.mubr.msk.f32.mxu0 %vm873_vm6, %v3278_v61  ;;  %3074 = vmatprep.mubr.msk.f32.mxu1 %vm873_vm6, %v3281_v60 }
 0x191   : > { %v3282_v62 = vpop.trf.xlu0 }
 0x192   : > { %v3286_v63 = vunpack.i.h.bf16 %v3282_v62  ;;  %v3283_v0 = vunpack.i.l.bf16 %v3282_v62 }
 0x194   : > { %3047 = vmatmul.mubr.msk.f32.gmra.mxu0 %vm873_vm6, %v3283_v0  ;;  %3075 = vmatmul.mubr.msk.f32.gmra.mxu1 %vm873_vm6, %v3286_v63 }
 0x195   : > { %v3287_v1 = vpop.trf.xlu0 }
 0x196   : > { %v3291_v2 = vunpack.i.h.bf16 %v3287_v1  ;;  %v3288_v3 = vunpack.i.l.bf16 %v3287_v1 }
 0x198   : > { %3049 = vmatprep.mubr.msk.f32.mxu0 %vm873_vm6, %v3288_v3  ;;  %3077 = vmatprep.mubr.msk.f32.mxu1 %vm873_vm6, %v3291_v2  ;;  %v3860_v2 = vld [vmem:[%s4275_s9] ss:$0 sm:$0xff] }
 0x199   : > { %v3292_v4 = vpop.trf.xlu0 }
 0x19a   : > { %v3296_v5 = vunpack.i.h.bf16 %v3292_v4  ;;  %v3293_v6 = vunpack.i.l.bf16 %v3292_v4 }
 0x19c   : > { %3050 = vmatmul.mubr.msk.f32.gmra.mxu0 %vm873_vm6, %v3293_v6  ;;  %3078 = vmatmul.mubr.msk.f32.gmra.mxu1 %vm873_vm6, %v3296_v5 }
 0x19d   : > { %v3297_v7 = vpop.trf.xlu0 }
 0x19e   : > { %v3301_v8 = vunpack.i.h.bf16 %v3297_v7  ;;  %v3298_v9 = vunpack.i.l.bf16 %v3297_v7 }
 0x1a0   : > { %3052 = vmatprep.mubr.msk.f32.mxu0 %vm873_vm6, %v3298_v9  ;;  %3080 = vmatprep.mubr.msk.f32.mxu1 %vm873_vm6, %v3301_v8 }
 0x1a1   : > { %v3302_v10 = vpop.trf.xlu0 }
 0x1a2   : > { %v3306_v11 = vunpack.i.h.bf16 %v3302_v10  ;;  %v3303_v12 = vunpack.i.l.bf16 %v3302_v10 }
 0x1a4   : > { %3053 = vmatmul.mubr.msk.f32.gmra.mxu0 %vm873_vm6, %v3303_v12  ;;  %3081 = vmatmul.mubr.msk.f32.gmra.mxu1 %vm873_vm6, %v3306_v11 }
 0x1a5   : > { %v3307_v13 = vpop.trf.xlu0 }
 0x1a6   : > { %v3311_v14 = vunpack.i.h.bf16 %v3307_v13  ;;  %v3308_v15 = vunpack.i.l.bf16 %v3307_v13 }
 0x1a8   : > { %3055 = vmatprep.mubr.msk.f32.mxu0 %vm873_vm6, %v3308_v15  ;;  %3083 = vmatprep.mubr.msk.f32.mxu1 %vm873_vm6, %v3311_v14 }
 0x1a9   : > { %v3312_v16 = vpop.trf.xlu0 }
 0x1aa   : > { %v3316_v17 = vunpack.i.h.bf16 %v3312_v16  ;;  %v3313_v18 = vunpack.i.l.bf16 %v3312_v16 }
 0x1ac   : > { %3056 = vmatmul.mubr.msk.f32.gmra.mxu0 %vm873_vm6, %v3313_v18  ;;  %3084 = vmatmul.mubr.msk.f32.gmra.mxu1 %vm873_vm6, %v3316_v17 }
 0x1ad   : > { %3088 = vmatprep.mubr.msk.f32.mxu0 %vm1309_vm7, %v1292_v19 }
 0x1b0   : > { %3089 = vmatmul.mubr.msk.f32.vlgmr.msra.gmra.mxu0 %vm1309_vm7, %v1293_v20 }
 0x1b1   : > { %3091 = vmatprep.mubr.msk.f32.mxu0 %vm1309_vm7, %v1294_v21 }
 0x1b4   : > { %3092 = vmatmul.mubr.msk.f32.gmra.mxu0 %vm1309_vm7, %v1295_v23 }
 0x1b5   : > { %3094 = vmatprep.mubr.msk.f32.mxu0 %vm1309_vm7, %v1296_v25 }
 0x1b8   : > { %3095 = vmatmul.mubr.msk.f32.gmra.mxu0 %vm1309_vm7, %v1297_v26 }
 0x1b9   : > { %3097 = vmatprep.mubr.msk.f32.mxu0 %vm1309_vm7, %v1298_v27 }
 0x1bc   : > { %3098 = vmatmul.mubr.msk.f32.gmra.mxu0 %vm1309_vm7, %v1299_v28 }
 0x1bd   : > { %3100 = vmatprep.mubr.msk.f32.mxu0 %vm1309_vm7, %v1300_v29 }
 0x1c0   : > { %3101 = vmatmul.mubr.msk.f32.gmra.mxu0 %vm1309_vm7, %v1301_v30 }
 0x1c1   : > { %3103 = vmatprep.mubr.msk.f32.mxu0 %vm1309_vm7, %v1302_v32 }
 0x1c4   : > { %3104 = vmatmul.mubr.msk.f32.gmra.mxu0 %vm1309_vm7, %v1303_v33 }
 0x1c5   : > { %3106 = vmatprep.mubr.msk.f32.mxu0 %vm1309_vm7, %v1304_v34 }
 0x1c8   : > { %3107 = vmatmul.mubr.msk.f32.gmra.mxu0 %vm1309_vm7, %v1305_v35 }
 0x1c9   : > { %3109 = vmatprep.mubr.msk.f32.mxu0 %vm1309_vm7, %v1306_v36 }
 0x1cc   : > { %3110 = vmatmul.mubr.msk.f32.gmra.mxu0 %vm1309_vm7, %v1307_v38 }
 0x1cd   : > { %3176 = vmatprep.mubr.f32.mxu0 %v2268_v37 }
 0x234   : > { %v3036_v41 = vpop.f32.mrf.mxu0  ;;  %v3064_v50 = vpop.f32.mrf.mxu1 }
 0x235   : > { %v1219_v0 = vadd.f32 %v3064_v50, %v3036_v41 }
 0x236   : > { %v988_v42 = vpop.f32.mrf.mxu0  ;;  %v1213_v52 = vpop.f32.mrf.mxu1 }
 0x237   : > { %v1214_v3 = vadd.f32 %v1213_v52, %v988_v42 }
 0x23c   : > { %v3039_v43 = vpop.f32.mrf.mxu0  ;;  %v3067_v54 = vpop.f32.mrf.mxu1 }
 0x23d   : > { %v1229_v7 = vadd.f32 %v3067_v54, %v3039_v43 }
 0x23e   : > { %v998_v44 = vpop.f32.mrf.mxu0  ;;  %v1223_v56 = vpop.f32.mrf.mxu1 }
 0x23f   : > { %v1224_v12 = vadd.f32 %v1223_v56, %v998_v44 }
 0x244   : > { %v3042_v45 = vpop.f32.mrf.mxu0  ;;  %v3070_v58 = vpop.f32.mrf.mxu1 }
 0x245   : > { %v1239_v16 = vadd.f32 %v3070_v58, %v3042_v45 }
 0x246   : > { %v1008_v46 = vpop.f32.mrf.mxu0  ;;  %v1233_v60 = vpop.f32.mrf.mxu1 }
 0x247   : > { %v1234_v23 = vadd.f32 %v1233_v60, %v1008_v46 }
 0x24c   : > { %v3045_v47 = vpop.f32.mrf.mxu0  ;;  %v3073_v62 = vpop.f32.mrf.mxu1 }
 0x24d   : > { %v1249_v30 = vadd.f32 %v3073_v62, %v3045_v47 }
 0x24e   : > { %v1018_v48 = vpop.f32.mrf.mxu0  ;;  %v1243_v4 = vpop.f32.mrf.mxu1 }
 0x24f   : > { %v1244_v36 = vadd.f32 %v1243_v4, %v1018_v48 }
 0x254   : > { %v3048_v49 = vpop.f32.mrf.mxu0  ;;  %v3076_v8 = vpop.f32.mrf.mxu1 }
 0x255   : > { %v1259_v24 = vadd.f32 %v3076_v8, %v3048_v49 }
 0x256   : > { %v3843_v51 = vpop.f32.mrf.mxu0  ;;  %v1253_v18 = vpop.f32.mrf.mxu1 }
 0x257   : > { %v1254_v46 = vadd.f32 %v1253_v18, %v3843_v51 }
 0x25c   : > { %v3845_v53 = vpop.f32.mrf.mxu0  ;;  %v3079_v26 = vpop.f32.mrf.mxu1 }
 0x25d   : > { %v1269_v51 = vadd.f32 %v3079_v26, %v3845_v53 }
 0x25e   : > { %v3847_v55 = vpop.f32.mrf.mxu0  ;;  %v1263_v38 = vpop.f32.mrf.mxu1 }
 0x264   : > { %v3849_v57 = vpop.f32.mrf.mxu0  ;;  %v3082_v42 = vpop.f32.mrf.mxu1 }
 0x265   : > { %v1279_v8 = vadd.f32 %v3082_v42, %v3849_v57 }
 0x266   : > { %v3851_v59 = vpop.f32.mrf.mxu0  ;;  %v1273_v54 = vpop.f32.mrf.mxu1 }
 0x26c   : > { %v3853_v61 = vpop.f32.mrf.mxu0 }
 0x26e   : > { %v3855_v63 = vpop.f32.mrf.mxu0 }
 0x270   : > { %v3090_v1 = vpop.f32.mrf.mxu0 }
 0x271   : > { %v1508_v5 = vadd.f32 %v3090_v1, %v1219_v0  ;;  %v1264_v0 = vadd.f32 %v1263_v38, %v3847_v55 }
 0x272   : > { %v1428_v6 = vpop.f32.mrf.mxu0 }
 0x273   : > { %v3863_v9 = vadd.f32 %v3860_v2, %v1508_v5  ;;  %v1507_v10 = vadd.f32 %v1428_v6, %v1214_v3  ;;  %v3085_v3 = vpop.f32.mrf.mxu1 }
 0x274   : > { %v3093_v11 = vpop.f32.mrf.mxu0 }
 0x275   : > { %v2805_v13 = vmul.f32 -1.442695, %v3863_v9  ;;  %v3867_v14 = vadd.f32 %v3860_v2, %v1507_v10  ;;  %v1510_v15 = vadd.f32 %v3093_v11, %v1229_v7 }
 0x276   : > { %v1438_v17 = vpop.f32.mrf.mxu0 }
 0x277   : > { %3319 = vpow2.f32 %v2805_v13  ;;  %v2804_v19 = vmul.f32 -1.442695, %v3867_v14  ;;  %v3871_v20 = vadd.f32 %v3860_v2, %v1510_v15  ;;  %v1509_v21 = vadd.f32 %v1438_v17, %v1224_v12  ;;  %v1283_v17 = vpop.f32.mrf.mxu1 }
 0x278   : > { %v3096_v25 = vpop.f32.mrf.mxu0 }
 0x279   : > { %3321 = vpow2.f32 %v2804_v19  ;;  %v2807_v27 = vmul.f32 -1.442695, %v3871_v20  ;;  %v3875_v28 = vadd.f32 %v3860_v2, %v1509_v21  ;;  %v1512_v29 = vadd.f32 %v3096_v25, %v1239_v16 }
 0x27a   : > { %v1448_v32 = vpop.f32.mrf.mxu0  ;;  %v1289_v25 = vadd.f32 %v3085_v3, %v3853_v61 }
 0x27b   : > { %3323 = vpow2.f32 %v2807_v27  ;;  %v2806_v33 = vmul.f32 -1.442695, %v3875_v28  ;;  %v3879_v34 = vadd.f32 %v3860_v2, %v1512_v29  ;;  %v1511_v35 = vadd.f32 %v1448_v32, %v1234_v23 }
 0x27c   : > { %v3099_v37 = vpop.f32.mrf.mxu0  ;;  %v1274_v23 = vadd.f32 %v1273_v54, %v3851_v59 }
 0x27d   : > { %3325 = vpow2.f32 %v2806_v33  ;;  %v2809_v39 = vmul.f32 -1.442695, %v3879_v34  ;;  %v3883_v40 = vadd.f32 %v3860_v2, %v1511_v35  ;;  %v1514_v22 = vadd.f32 %v3099_v37, %v1249_v30 }
 0x27e   : > { %v1458_v41 = vpop.f32.mrf.mxu0  ;;  %v1284_v35 = vadd.f32 %v1283_v17, %v3855_v63 }
 0x27f   : > { %3327 = vpow2.f32 %v2809_v39  ;;  %v2808_v43 = vmul.f32 -1.442695, %v3883_v40  ;;  %v3887_v44 = vadd.f32 %v3860_v2, %v1514_v22  ;;  %v1513_v45 = vadd.f32 %v1458_v41, %v1244_v36 }
 0x280   : > { %v3102_v47 = vpop.f32.mrf.mxu0 }
 0x281   : > { %3329 = vpow2.f32 %v2808_v43  ;;  %v2811_v48 = vmul.f32 -1.442695, %v3887_v44  ;;  %v3892_v50 = vadd.f32 %v3860_v2, %v1513_v45  ;;  %v1516_v52 = vadd.f32 %v3102_v47, %v1259_v24 }
 0x282   : > { %v1468_v49 = vpop.f32.mrf.mxu0 }
 0x283   : > { %3331 = vpow2.f32 %v2811_v48  ;;  %v2810_v56 = vmul.f32 -1.442695, %v3892_v50  ;;  %v3896_v58 = vadd.f32 %v3860_v2, %v1516_v52  ;;  %v1515_v60 = vadd.f32 %v1468_v49, %v1254_v46 }
 0x284   : > { %v3320_v62 = vpop.eup %3319  ;;  %v3105_v1 = vpop.f32.mrf.mxu0 }
 0x285   : > { %v1595_v4 = vadd.f32 1.0, %v3320_v62  ;;  %3333 = vpow2.f32 %v2810_v56  ;;  %v2813_v5 = vmul.f32 -1.442695, %v3896_v58  ;;  %v3902_v6 = vadd.f32 %v3860_v2, %v1515_v60 }
 0x286   : > { %v3322_v7 = vpop.eup %3321  ;;  %v1518_v10 = vadd.f32 %v3105_v1, %v1269_v51  ;;  %v1478_v11 = vpop.f32.mrf.mxu0 }
 0x287   : > { %3335 = vrcp.f32 %v1595_v4  ;;  %v1594_v12 = vadd.f32 1.0, %v3322_v7  ;;  %v2812_v53 = vmul.f32 -1.442695, %v3902_v6  ;;  %v1517_v13 = vadd.f32 %v1478_v11, %v1264_v0 }
 0x288   : > { %v3324_v55 = vpop.eup %3323  ;;  %3337 = vpow2.f32 %v2813_v5  ;;  %v3907_v15 = vadd.f32 %v3860_v2, %v1518_v10  ;;  %v3108_v16 = vpop.f32.mrf.mxu0 }
 0x289   : > { %3339 = vrcp.f32 %v1594_v12  ;;  %v1597_v18 = vadd.f32 1.0, %v3324_v55  ;;  %v3910_v19 = vadd.f32 %v3860_v2, %v1517_v13  ;;  %v1520_v57 = vadd.f32 %v3108_v16, %v1279_v8 }
 0x28a   : > { %v3326_v21 = vpop.eup %3325  ;;  %3341 = vpow2.f32 %v2812_v53  ;;  %v2815_v26 = vmul.f32 -1.442695, %v3907_v15  ;;  %v1488_v27 = vpop.f32.mrf.mxu0 }
 0x28b   : > { %3343 = vrcp.f32 %v1597_v18  ;;  %v1596_v29 = vadd.f32 1.0, %v3326_v21  ;;  %v2814_v30 = vmul.f32 -1.442695, %v3910_v19  ;;  %v3917_v32 = vadd.f32 %v3860_v2, %v1520_v57 }
 0x28c   : > { %v3328_v33 = vpop.eup %3327  ;;  %3345 = vpow2.f32 %v2815_v26  ;;  %v1519_v36 = vadd.f32 %v1488_v27, %v1274_v23  ;;  %v3111_v37 = vpop.f32.mrf.mxu0 }
 0x28d   : > { %3347 = vrcp.f32 %v1596_v29  ;;  %v1599_v59 = vadd.f32 1.0, %v3328_v33  ;;  %v2817_v61 = vmul.f32 -1.442695, %v3917_v32  ;;  %v1522_v38 = vadd.f32 %v3111_v37, %v1289_v25 }
 0x28e   : > { %v3330_v39 = vpop.eup %3329  ;;  %3349 = vpow2.f32 %v2814_v30  ;;  %v3922_v22 = vadd.f32 %v3860_v2, %v1519_v36  ;;  %v1498_v24 = vpop.f32.mrf.mxu0 }
 0x28f   : > { %3351 = vrcp.f32 %v1599_v59  ;;  %v1598_v41 = vadd.f32 1.0, %v3330_v39  ;;  %v3925_v42 = vadd.f32 %v3860_v2, %v1522_v38  ;;  %v1521_v63 = vadd.f32 %v1498_v24, %v1284_v35 }
 0x290   : > { %v3332_v43 = vpop.eup %3331  ;;  %3353 = vpow2.f32 %v2817_v61  ;;  %v2816_v45 = vmul.f32 -1.442695, %v3922_v22 }
 0x291   : > { %3355 = vrcp.f32 %v1598_v41  ;;  %v1601_v46 = vadd.f32 1.0, %v3332_v43  ;;  %v2819_v47 = vmul.f32 -1.442695, %v3925_v42  ;;  %v3930_v48 = vadd.f32 %v3860_v2, %v1521_v63 }
 0x292   : > { %v3334_v52 = vpop.eup %3333  ;;  %3357 = vpow2.f32 %v2816_v45 }
 0x293   : > { %3359 = vrcp.f32 %v1601_v46  ;;  %v1600_v49 = vadd.f32 1.0, %v3334_v52  ;;  %v2818_v54 = vmul.f32 -1.442695, %v3930_v48 }
 0x294   : > { %v3336_v56 = vpop.eup %3335  ;;  %3361 = vpow2.f32 %v2819_v47 }
 0x295   : > { %v3338_v60 = vpop.eup %3337  ;;  %3363 = vrcp.f32 %v1600_v49  ;;  %v1643_v2 = vmul.f32 %v3336_v56, %v3863_v9 }
 0x296   : > { %v3340_v62 = vpop.eup %3339  ;;  %v1603_v51 = vadd.f32 1.0, %v3338_v60  ;;  %3365 = vpow2.f32 %v2818_v54 }
 0x297   : > { %v3342_v0 = vpop.eup %3341  ;;  %v1642_v1 = vmul.f32 %v3340_v62, %v3867_v14 }
 0x298   : > { %v3344_v3 = vpop.eup %3343  ;;  %v1602_v4 = vadd.f32 1.0, %v3342_v0  ;;  %3367 = vrcp.f32 %v1603_v51 }
 0x299   : > { %v3346_v5 = vpop.eup %3345  ;;  %3120 = vmatprep.mubr.msk.f32.mxu1 %vm1669_vm8, %v1642_v1  ;;  %v1645_v53 = vmul.f32 %v3344_v3, %v3871_v20 }
 0x29a   : > { %v3348_v7 = vpop.eup %3347  ;;  %3369 = vrcp.f32 %v1602_v4  ;;  %v1605_v8 = vadd.f32 1.0, %v3346_v5  ;;  %3121 = vmatmul.mubr.msk.f32.vlgmr.msra.gmra.mxu1 %vm1669_vm8, %v1643_v2 }
 0x29b   : > { %v3350_v10 = vpop.eup %3349  ;;  %v1644_v11 = vmul.f32 %v3348_v7, %v3875_v28 }
 0x29c   : > { %v3352_v12 = vpop.eup %3351  ;;  %v1604_v14 = vadd.f32 1.0, %v3350_v10  ;;  %3371 = vrcp.f32 %v1605_v8 }
 0x29d   : > { %v3354_v13 = vpop.eup %3353  ;;  %3123 = vmatprep.mubr.msk.f32.mxu1 %vm1669_vm8, %v1644_v11  ;;  %v1647_v57 = vmul.f32 %v3352_v12, %v3879_v34 }
 0x29e   : > { %v3356_v9 = vpop.eup %3355  ;;  %3373 = vrcp.f32 %v1604_v14  ;;  %v1607_v55 = vadd.f32 1.0, %v3354_v13  ;;  %3124 = vmatmul.mubr.msk.f32.gmra.mxu1 %vm1669_vm8, %v1645_v53 }
 0x29f   : > { %v3358_v16 = vpop.eup %3357  ;;  %v1646_v17 = vmul.f32 %v3356_v9, %v3883_v40 }
 0x2a0   : > { %v3360_v18 = vpop.eup %3359  ;;  %v1606_v28 = vadd.f32 1.0, %v3358_v16  ;;  %3375 = vrcp.f32 %v1607_v55 }
 0x2a1   : > { %v3362_v21 = vpop.eup %3361  ;;  %3126 = vmatprep.mubr.msk.f32.mxu1 %vm1669_vm8, %v1646_v17  ;;  %v1649_v27 = vmul.f32 %v3360_v18, %v3887_v44 }
 0x2a2   : > { %v3364_v20 = vpop.eup %3363  ;;  %3377 = vrcp.f32 %v1606_v28  ;;  %v1609_v23 = vadd.f32 1.0, %v3362_v21  ;;  %3127 = vmatmul.mubr.msk.f32.gmra.mxu1 %vm1669_vm8, %v1647_v57 }
 0x2a3   : > { %v3366_v25 = vpop.eup %3365  ;;  %v1648_v26 = vmul.f32 %v3364_v20, %v3892_v50 }
 0x2a4   : > { %v1608_v29 = vadd.f32 1.0, %v3366_v25  ;;  %3379 = vrcp.f32 %v1609_v23 }
 0x2a5   : > { %3129 = vmatprep.mubr.msk.f32.mxu1 %vm1669_vm8, %v1648_v26  ;;  %v3368_v34 = vpop.eup %3367 }
 0x2a6   : > { %3381 = vrcp.f32 %v1608_v29  ;;  %3130 = vmatmul.mubr.msk.f32.gmra.mxu1 %vm1669_vm8, %v1649_v27  ;;  %v1651_v33 = vmul.f32 %v3368_v34, %v3896_v58 }
 0x2a7   : > { %v3370_v40 = vpop.eup %3369 }
 0x2a8   : > { %v1650_v30 = vmul.f32 %v3370_v40, %v3902_v6 }
 0x2a9   : > { %v3372_v35 = vpop.eup %3371 }
 0x2aa   : > { %3132 = vmatprep.mubr.msk.f32.mxu1 %vm1669_vm8, %v1650_v30  ;;  %v1653_v50 = vmul.f32 %v3372_v35, %v3907_v15 }
 0x2ab   : > { %v3374_v36 = vpop.eup %3373  ;;  %3133 = vmatmul.mubr.msk.f32.gmra.mxu1 %vm1669_vm8, %v1651_v33 }
 0x2ac   : > { %v1652_v44 = vmul.f32 %v3374_v36, %v3910_v19 }
 0x2ad   : > { %v3376_v37 = vpop.eup %3375 }
 0x2ae   : > { %3135 = vmatprep.mubr.msk.f32.mxu1 %vm1669_vm8, %v1652_v44  ;;  %v1655_v58 = vmul.f32 %v3376_v37, %v3917_v32 }
 0x2af   : > { %v3378_v59 = vpop.eup %3377  ;;  %3136 = vmatmul.mubr.msk.f32.gmra.mxu1 %vm1669_vm8, %v1653_v50 }
 0x2b0   : > { %v1654_v6 = vmul.f32 %v3378_v59, %v3922_v22 }
 0x2b1   : > { %v3380_v61 = vpop.eup %3379 }
 0x2b2   : > { %3138 = vmatprep.mubr.msk.f32.mxu1 %vm1669_vm8, %v1654_v6  ;;  %v1657_v15 = vmul.f32 %v3380_v61, %v3925_v42  ;;  %v3976_v42 = vld [vmem:[%s4277_s11] ss:$0 sm:$0xff] }
 0x2b3   : > { %v3382_v38 = vpop.eup %3381  ;;  %3139 = vmatmul.mubr.msk.f32.gmra.mxu1 %vm1669_vm8, %v1655_v58 }
 0x2b4   : > { %v1656_v19 = vmul.f32 %v3382_v38, %v3930_v48 }
 0x2b6   : > { %3141 = vmatprep.mubr.msk.f32.mxu1 %vm1669_vm8, %v1656_v19 }
 0x2b7   : > { %3142 = vmatmul.mubr.msk.f32.gmra.mxu1 %vm1669_vm8, %v1657_v15 }
 0x35a   : > { %v3965_v39 = vpop.f32.mrf.mxu1 }
 0x35c   : > { %v3967_v24 = vpop.f32.mrf.mxu1 }
 0x35e   : > { %v3969_v22 = vpop.f32.mrf.mxu1 }
 0x35f   : > { %v4027_v44 = vadd.f32 %v3969_v22, %v3976_v42 }
 0x360   : > { %v3971_v32 = vpop.f32.mrf.mxu1 }
 0x361   : > { %v2840_v58 = vmul.f32 -1.442695, %v4027_v44  ;;  %v4033_v61 = vadd.f32 %v3976_v42, %v3971_v32 }
 0x362   : > { %v3128_v41 = vpop.f32.mrf.mxu1 }
 0x363   : > { %v4018_v26 = vadd.f32 %v3128_v41, %v3976_v42 }
 0x364   : > { %v1804_v63 = vpop.f32.mrf.mxu1 }
 0x365   : > { %v2842_v30 = vmul.f32 -1.442695, %v4018_v26  ;;  %v4023_v33 = vadd.f32 %v3976_v42, %v1804_v63  ;;  %v4041_v63 = vld [vmem:[%s4278_s12] ss:$0 sm:$0xff] }
 0x366   : > { %v3131_v43 = vpop.f32.mrf.mxu1 }
 0x367   : > { %v3990_v51 = vadd.f32 %v3131_v43, %v3976_v42  ;;  %v2841_v50 = vmul.f32 -1.442695, %v4023_v33  ;;  %v2839_v43 = vmul.f32 -1.442695, %v4033_v61 }
 0x368   : > { %v1814_v45 = vpop.f32.mrf.mxu1 }
 0x369   : > { %v2844_v7 = vmul.f32 -1.442695, %v3990_v51  ;;  %v4015_v18 = vadd.f32 %v3976_v42, %v1814_v45 }
 0x36b   : > { %v3134_v46 = vpop.f32.mrf.mxu1  ;;  %v2843_v27 = vmul.f32 -1.442695, %v4015_v18 }
 0x36c   : > { %v3979_v47 = vadd.f32 %v3134_v46, %v3976_v42 }
 0x36d   : > { %v1824_v48 = vpop.f32.mrf.mxu1 }
 0x36e   : > { %v2846_v52 = vmul.f32 -1.442695, %v3979_v47  ;;  %v3983_v49 = vadd.f32 %v3976_v42, %v1824_v48  ;;  %v4051_v48 = vadd.f32 %v3965_v39, %v3976_v42  ;;  %v4064_v39 = vadd.f32 %v3976_v42, %v3967_v24 }
 0x36f   : > { %v3137_v54 = vpop.f32.mrf.mxu1 }
 0x370   : > { %v3986_v56 = vadd.f32 %v3137_v54, %v3976_v42  ;;  %3383 = vpow2.f32 %v2846_v52  ;;  %v2845_v60 = vmul.f32 -1.442695, %v3983_v49 }
 0x371   : > { %v1834_v62 = vpop.f32.mrf.mxu1 }
 0x372   : > { %v2848_v0 = vmul.f32 -1.442695, %v3986_v56  ;;  %v3994_v1 = vadd.f32 %v3976_v42, %v1834_v62 }
 0x373   : > { %v3140_v3 = vpop.f32.mrf.mxu1 }
 0x374   : > { %3385 = vpow2.f32 %v2848_v0  ;;  %v2847_v2 = vmul.f32 -1.442695, %v3994_v1  ;;  %v3998_v4 = vadd.f32 %v3140_v3, %v3976_v42 }
 0x375   : > { %3387 = vpow2.f32 %v2845_v60  ;;  %v1844_v5 = vpop.f32.mrf.mxu1 }
 0x376   : > { %3389 = vpow2.f32 %v2847_v2  ;;  %v2850_v8 = vmul.f32 -1.442695, %v3998_v4  ;;  %v4003_v10 = vadd.f32 %v3976_v42, %v1844_v5 }
 0x377   : > { %v3143_v11 = vpop.f32.mrf.mxu1 }
 0x378   : > { %3391 = vpow2.f32 %v2850_v8  ;;  %v4006_v12 = vadd.f32 %v3143_v11, %v3976_v42  ;;  %v2849_v14 = vmul.f32 -1.442695, %v4003_v10  ;;  %v2837_v11 = vmul.f32 -1.442695, %v4064_v39 }
 0x379   : > { %v1854_v53 = vpop.f32.mrf.mxu1  ;;  %3393 = vpow2.f32 %v2844_v7 }
 0x37a   : > { %v4010_v13 = vadd.f32 %v3976_v42, %v1854_v53  ;;  %v2852_v9 = vmul.f32 -1.442695, %v4006_v12  ;;  %3395 = vpow2.f32 %v2849_v14 }
 0x37c   : > { %v2851_v16 = vmul.f32 -1.442695, %v4010_v13  ;;  %3397 = vpow2.f32 %v2852_v9 }
 0x37d   : > { %v3384_v55 = vpop.eup %3383 }
 0x37e   : > { %v1920_v57 = vadd.f32 1.0, %v3384_v55  ;;  %3399 = vpow2.f32 %v2851_v16 }
 0x381   : > { %v3386_v17 = vpop.eup %3385 }
 0x382   : > { %v3388_v28 = vpop.eup %3387  ;;  %v1922_v21 = vadd.f32 1.0, %v3386_v17 }
 0x383   : > { %v3390_v20 = vpop.eup %3389  ;;  %v1919_v29 = vadd.f32 1.0, %v3388_v28 }
 0x384   : > { %3401 = vrcp.f32 %v1922_v21  ;;  %v1921_v23 = vadd.f32 1.0, %v3390_v20 }
 0x385   : > { %v3392_v25 = vpop.eup %3391  ;;  %3403 = vrcp.f32 %v1920_v57 }
 0x386   : > { %3405 = vrcp.f32 %v1921_v23  ;;  %v1924_v34 = vadd.f32 1.0, %v3392_v25  ;;  %v3394_v40 = vpop.eup %3393 }
 0x387   : > { %v1918_v35 = vadd.f32 1.0, %v3394_v40  ;;  %v3396_v36 = vpop.eup %3395 }
 0x388   : > { %3407 = vrcp.f32 %v1924_v34  ;;  %v1923_v59 = vadd.f32 1.0, %v3396_v36 }
 0x389   : > { %3409 = vpow2.f32 %v2843_v27  ;;  %v3398_v37 = vpop.eup %3397 }
 0x38a   : > { %3411 = vrcp.f32 %v1919_v29  ;;  %v1926_v19 = vadd.f32 1.0, %v3398_v37 }
 0x38b   : > { %3413 = vpow2.f32 %v2842_v30  ;;  %v3400_v6 = vpop.eup %3399 }
 0x38c   : > { %3415 = vrcp.f32 %v1918_v35  ;;  %v1925_v52 = vadd.f32 1.0, %v3400_v6 }
 0x38d   : > { %3417 = vpow2.f32 %v2841_v50 }
 0x38e   : > { %3419 = vrcp.f32 %v1923_v59 }
 0x38f   : > { %3421 = vpow2.f32 %v2840_v58 }
 0x390   : > { %3423 = vrcp.f32 %v1926_v19 }
 0x391   : > { %v3402_v38 = vpop.eup %3401  ;;  %3425 = vpow2.f32 %v2839_v43 }
 0x392   : > { %v3404_v15 = vpop.eup %3403  ;;  %v4036_v22 = vmul.f32 %v3402_v38, %v3986_v56  ;;  %3427 = vrcp.f32 %v1925_v52 }
 0x393   : > { %v3406_v41 = vpop.eup %3405  ;;  %v4054_v56 = vmul.f32 %v3404_v15, %v3979_v47  ;;  %v2838_v47 = vmul.f32 -1.442695, %v4051_v48 }
 0x394   : > { %v4045_v32 = vmul.f32 %v3406_v41, %v3994_v1  ;;  %v1993_v45 = vmul.f32 %v4041_v63, %v4036_v22 }
 0x395   : > { %v3408_v46 = vpop.eup %3407  ;;  %v1991_v24 = vmul.f32 %v4041_v63, %v4054_v56  ;;  %3429 = vpow2.f32 %v2838_v47 }
 0x396   : > { %v3410_v54 = vpop.eup %3409  ;;  %v4057_v60 = vmul.f32 %v3408_v46, %v3998_v4  ;;  %v2031_v62 = vsel %vm1669_vm8, %v1993_v45, 0.0  ;;  %v1992_v0 = vmul.f32 %v4041_v63, %v4045_v32 }
 0x397   : > { %v3412_v1 = vpop.eup %3411  ;;  %2032 = vadd.xlane.f32.xlu1 %v2031_v62  ;;  %v1917_v2 = vadd.f32 1.0, %v3410_v54 }
 0x398   : > { %v1995_v3 = vmul.f32 %v4041_v63, %v4057_v60  ;;  %v3414_v4 = vpop.eup %3413  ;;  %v4070_v5 = vmul.f32 %v3412_v1, %v3983_v49  ;;  %v2028_v7 = vsel %vm1669_vm8, %v1992_v0, 0.0  ;;  %v2025_v49 = vsel %vm1669_vm8, %v1991_v24, 0.0 }
 0x399   : > { %v3416_v42 = vpop.eup %3415  ;;  %v1916_v53 = vadd.f32 1.0, %v3414_v4  ;;  %3431 = vrcp.f32 %v1917_v2 }
 0x39a   : > { %v2037_v8 = vsel %vm1669_vm8, %v1995_v3, 0.0  ;;  %v3418_v14 = vpop.eup %3417  ;;  %v4078_v9 = vmul.f32 %v3416_v42, %v3990_v51  ;;  %v1990_v55 = vmul.f32 %v4041_v63, %v4070_v5  ;;  %3433 = vpow2.f32 %v2837_v11 }
 0x39b   : > { %2029 = vadd.xlane.f32.xlu1 %v2028_v7  ;;  %2038 = vadd.xlane.f32.xlu0 %v2037_v8  ;;  %v3420_v16 = vpop.eup %3419  ;;  %3435 = vrcp.f32 %v1916_v53  ;;  %v1915_v28 = vadd.f32 1.0, %v3418_v14  ;;  %v3558_v53 = vmov 0  }
 0x39c   : > { %v3422_v17 = vpop.eup %3421  ;;  %v4084_v21 = vmul.f32 %v3420_v16, %v4003_v10  ;;  %v2022_v20 = vsel %vm1669_vm8, %v1990_v55, 0.0  ;;  %v1989_v51 = vmul.f32 %v4041_v63, %v4078_v9  ;;  %3317 = vset.pattern.permute.xlu1 %v3558_v53  ;;  %3318 = vset.pattern.permute.xlu0 %v3558_v53 }
 0x39d   : > { %v3424_v57 = vpop.eup %3423  ;;  %v1914_v25 = vadd.f32 1.0, %v3422_v17  ;;  %3437 = vrcp.f32 %v1915_v28 }
 0x39e   : > { %v3426_v23 = vpop.eup %3425  ;;  %v4090_v29 = vmul.f32 %v3424_v57, %v4006_v12  ;;  %v2019_v34 = vsel %vm1669_vm8, %v1989_v51, 0.0  ;;  %v1994_v40 = vmul.f32 %v4041_v63, %v4084_v21 }
 0x39f   : > { %2026 = vadd.xlane.f32.xlu1 %v2025_v49  ;;  %v3428_v27 = vpop.eup %3427  ;;  %3439 = vrcp.f32 %v1914_v25  ;;  %v1913_v30 = vadd.f32 1.0, %v3426_v23  ;;  %v4147_v49 = vld [vmem:[#allocation5] ss:$0 sm:$0xff] }
 0x3a0   : > { %v4096_v35 = vmul.f32 %v3428_v27, %v4010_v13  ;;  %v2034_v36 = vsel %vm1669_vm8, %v1994_v40, 0.0  ;;  %v1997_v50 = vmul.f32 %v4041_v63, %v4090_v29 }
 0x3a1   : > { %3441 = vrcp.f32 %v1913_v30 }
 0x3a2   : > { %v3430_v10 = vpop.eup %3429  ;;  %v2043_v38 = vsel %vm1669_vm8, %v1997_v50, 0.0  ;;  %v1996_v13 = vmul.f32 %v4041_v63, %v4096_v35 }
 0x3a3   : > { %2023 = vadd.xlane.f32.xlu1 %v2022_v20  ;;  %v1912_v59 = vadd.f32 1.0, %v3430_v10 }
 0x3a4   : > { %v2040_v41 = vsel %vm1669_vm8, %v1996_v13, 0.0 }
 0x3a5   : > { %3443 = vrcp.f32 %v1912_v59 }
 0x3a6   : > { %v3432_v37 = vpop.eup %3431 }
 0x3a7   : > { %2020 = vadd.xlane.f32.xlu1 %v2019_v34  ;;  %v3434_v12 = vpop.eup %3433  ;;  %v4102_v58 = vmul.f32 %v3432_v37, %v4015_v18 }
 0x3a8   : > { %v3436_v6 = vpop.eup %3435  ;;  %v1911_v19 = vadd.f32 1.0, %v3434_v12 }
 0x3a9   : > { %v4108_v15 = vmul.f32 %v3436_v6, %v4018_v26  ;;  %v1988_v43 = vmul.f32 %v4041_v63, %v4102_v58 }
 0x3aa   : > { %v3438_v45 = vpop.eup %3437  ;;  %3445 = vrcp.f32 %v1911_v19 }
 0x3ab   : > { %2035 = vadd.xlane.f32.xlu1 %v2034_v36  ;;  %v4114_v46 = vmul.f32 %v3438_v45, %v4023_v33  ;;  %v2016_v52 = vsel %vm1669_vm8, %v1988_v43, 0.0  ;;  %v1987_v54 = vmul.f32 %v4041_v63, %v4108_v15 }
 0x3ac   : > { %v3440_v18 = vpop.eup %3439 }
 0x3ad   : > { %v4120_v26 = vmul.f32 %v3440_v18, %v4027_v44  ;;  %v2013_v62 = vsel %vm1669_vm8, %v1987_v54, 0.0  ;;  %v1986_v0 = vmul.f32 %v4041_v63, %v4114_v46 }
 0x3ae   : > { %v3442_v1 = vpop.eup %3441 }
 0x3af   : > { %2044 = vadd.xlane.f32.xlu1 %v2043_v38  ;;  %v4126_v33 = vmul.f32 %v3442_v1, %v4033_v61  ;;  %v2010_v47 = vsel %vm1669_vm8, %v1986_v0, 0.0  ;;  %v1985_v2 = vmul.f32 %v4041_v63, %v4120_v26 }
 0x3b1   : > { %v2007_v4 = vsel %vm1669_vm8, %v1985_v2, 0.0  ;;  %v1984_v7 = vmul.f32 %v4041_v63, %v4126_v33 }
 0x3b2   : > { %v3444_v3 = vpop.eup %3443 }
 0x3b3   : > { %2041 = vadd.xlane.f32.xlu1 %v2040_v41  ;;  %v4132_v44 = vmul.f32 %v3444_v3, %v4051_v48  ;;  %v2004_v61 = vsel %vm1669_vm8, %v1984_v7, 0.0 }
 0x3b5   : > { %v1983_v42 = vmul.f32 %v4041_v63, %v4132_v44 }
 0x3b7   : > { %2017 = vadd.xlane.f32.xlu1 %v2016_v52  ;;  %v3446_v8 = vpop.eup %3445  ;;  %v2001_v11 = vsel %vm1669_vm8, %v1983_v42, 0.0 }
 0x3b8   : > { %v4138_v24 = vmul.f32 %v3446_v8, %v4064_v39 }
 0x3ba   : > { %v1982_v48 = vmul.f32 %v4041_v63, %v4138_v24 }
 0x3bb   : > { %2014 = vadd.xlane.f32.xlu1 %v2013_v62 }
 0x3bc   : > { %v1998_v14 = vsel %vm1669_vm8, %v1982_v48, 0.0 }
 0x3bf   : > { %2011 = vadd.xlane.f32.xlu1 %v2010_v47 }
 0x3c3   : > { %2008 = vadd.xlane.f32.xlu1 %v2007_v4 }
 0x3c7   : > { %2005 = vadd.xlane.f32.xlu1 %v2004_v61 }
 0x3cb   : > { %2002 = vadd.xlane.f32.xlu1 %v2001_v11 }
 0x3cf   : > { %1999 = vadd.xlane.f32.xlu1 %v1998_v14 }
 0x420   : > { %v2033_v39 = vpop.xlane.xlu1 %2032 }
 0x421   : > { %v2064_v16 = vadd.f32 %v4147_v49, %v2033_v39 }
 0x423   : > { %v2866_v28 = vmul.f32 -1.442695, %v2064_v16 }
 0x424   : > { %v2030_v55 = vpop.xlane.xlu1 %2029  ;;  %v2039_v25 = vpop.xlane.xlu0 %2038 }
 0x425   : > { %v2063_v63 = vadd.f32 %v4147_v49, %v2030_v55  ;;  %v2066_v10 = vadd.f32 %v4147_v49, %v2039_v25 }
 0x427   : > { %v2865_v40 = vmul.f32 -1.442695, %v2063_v63  ;;  %v2868_v36 = vmul.f32 -1.442695, %v2066_v10 }
 0x428   : > { %v2027_v17 = vpop.xlane.xlu1 %2026 }
 0x429   : > { %v2062_v57 = vadd.f32 %v4147_v49, %v2027_v17 }
 0x42b   : > { %v2864_v20 = vmul.f32 -1.442695, %v2062_v57 }
 0x42c   : > { %v2024_v51 = vpop.xlane.xlu1 %2023 }
 0x42d   : > { %3447 = vpow2.f32 %v2864_v20  ;;  %v2061_v23 = vadd.f32 %v4147_v49, %v2024_v51 }
 0x42e   : > { %3449 = vpow2.f32 %v2866_v28 }
 0x42f   : > { %v2863_v27 = vmul.f32 -1.442695, %v2061_v23 }
 0x430   : > { %v2021_v34 = vpop.xlane.xlu1 %2020 }
 0x431   : > { %3451 = vpow2.f32 %v2863_v27  ;;  %v2060_v54 = vadd.f32 %v4147_v49, %v2021_v34 }
 0x432   : > { %3453 = vpow2.f32 %v2865_v40 }
 0x433   : > { %3455 = vpow2.f32 %v2868_v36  ;;  %v2862_v2 = vmul.f32 -1.442695, %v2060_v54 }
 0x434   : > { %v2036_v30 = vpop.xlane.xlu1 %2035 }
 0x435   : > { %v2065_v50 = vadd.f32 %v4147_v49, %v2036_v30 }
 0x437   : > { %v2867_v37 = vmul.f32 -1.442695, %v2065_v50 }
 0x438   : > { %v2045_v12 = vpop.xlane.xlu1 %2044 }
 0x439   : > { %v2068_v59 = vadd.f32 %v4147_v49, %v2045_v12  ;;  %3457 = vpow2.f32 %v2867_v37 }
 0x43a   : > { %v3448_v6 = vpop.eup %3447 }
 0x43b   : > { %v2126_v38 = vadd.f32 1.0, %v3448_v6  ;;  %v2870_v13 = vmul.f32 -1.442695, %v2068_v59  ;;  %v3450_v19 = vpop.eup %3449 }
 0x43c   : > { %v2042_v41 = vpop.xlane.xlu1 %2041  ;;  %v2128_v18 = vadd.f32 1.0, %v3450_v19 }
 0x43d   : > { %3459 = vrcp.f32 %v2126_v38  ;;  %v2067_v43 = vadd.f32 %v4147_v49, %v2042_v41 }
 0x43e   : > { %v3452_v45 = vpop.eup %3451  ;;  %3461 = vpow2.f32 %v2870_v13 }
 0x43f   : > { %v2125_v52 = vadd.f32 1.0, %v3452_v45  ;;  %v2869_v62 = vmul.f32 -1.442695, %v2067_v43  ;;  %v3454_v3 = vpop.eup %3453 }
 0x440   : > { %v2018_v0 = vpop.xlane.xlu1 %2017  ;;  %v2127_v7 = vadd.f32 1.0, %v3454_v3  ;;  %v3456_v61 = vpop.eup %3455 }
 0x441   : > { %3463 = vrcp.f32 %v2125_v52  ;;  %v2059_v1 = vadd.f32 %v4147_v49, %v2018_v0  ;;  %v2130_v53 = vadd.f32 1.0, %v3456_v61 }
 0x442   : > { %3465 = vrcp.f32 %v2128_v18 }
 0x443   : > { %v2861_v47 = vmul.f32 -1.442695, %v2059_v1  ;;  %3467 = vpow2.f32 %v2869_v62 }
 0x444   : > { %v2015_v4 = vpop.xlane.xlu1 %2014 }
 0x445   : > { %3469 = vpow2.f32 %v2861_v47  ;;  %v2058_v8 = vadd.f32 %v4147_v49, %v2015_v4 }
 0x446   : > { %3471 = vpow2.f32 %v2862_v2  ;;  %v3458_v48 = vpop.eup %3457 }
 0x447   : > { %v2860_v42 = vmul.f32 -1.442695, %v2058_v8  ;;  %3473 = vrcp.f32 %v2127_v7  ;;  %v2129_v16 = vadd.f32 1.0, %v3458_v48 }
 0x448   : > { %v2012_v11 = vpop.xlane.xlu1 %2011 }
 0x449   : > { %v2057_v14 = vadd.f32 %v4147_v49, %v2012_v11  ;;  %3475 = vpow2.f32 %v2860_v42 }
 0x44a   : > { %v3460_v39 = vpop.eup %3459  ;;  %3477 = vrcp.f32 %v2130_v53 }
 0x44b   : > { %2212 = vperm.xlu1 %3317, %v3460_v39   ;;  %v3462_v55 = vpop.eup %3461  ;;  %v2859_v57 = vmul.f32 -1.442695, %v2057_v14  ;;  %3479 = vrcp.f32 %v2129_v16 }
 0x44c   : > { %v2009_v17 = vpop.xlane.xlu1 %2008  ;;  %v2132_v51 = vadd.f32 1.0, %v3462_v55 }
 0x44d   : > { %v2056_v28 = vadd.f32 %v4147_v49, %v2009_v17  ;;  %3481 = vpow2.f32 %v2859_v57 }
 0x44e   : > { %v3464_v20 = vpop.eup %3463  ;;  %3483 = vrcp.f32 %v2132_v51 }
 0x44f   : > { %2207 = vperm.xlu1 %3317, %v3464_v20   ;;  %v3466_v63 = vpop.eup %3465  ;;  %v2858_v23 = vmul.f32 -1.442695, %v2056_v28 }
 0x450   : > { %v2006_v25 = vpop.xlane.xlu1 %2005  ;;  %v3468_v27 = vpop.eup %3467 }
 0x451   : > { %v2055_v34 = vadd.f32 %v4147_v49, %v2006_v25  ;;  %v2131_v30 = vadd.f32 1.0, %v3468_v27  ;;  %3485 = vpow2.f32 %v2858_v23 }
 0x452   : > { %v3470_v40 = vpop.eup %3469 }
 0x453   : > { %v2123_v10 = vadd.f32 1.0, %v3470_v40  ;;  %2222 = vperm.xlu1 %3317, %v3466_v63   ;;  %v3472_v50 = vpop.eup %3471  ;;  %v2857_v37 = vmul.f32 -1.442695, %v2055_v34 }
 0x454   : > { %v2003_v36 = vpop.xlane.xlu1 %2002  ;;  %v3474_v59 = vpop.eup %3473  ;;  %v2124_v6 = vadd.f32 1.0, %v3472_v50 }
 0x455   : > { %3487 = vrcp.f32 %v2123_v10  ;;  %v2054_v12 = vadd.f32 %v4147_v49, %v2003_v36 }
 0x456   : > { %3489 = vrcp.f32 %v2131_v30  ;;  %v3476_v13 = vpop.eup %3475 }
 0x457   : > { %2217 = vperm.xlu1 %3317, %v3474_v59   ;;  %3491 = vpow2.f32 %v2857_v37  ;;  %v2856_v19 = vmul.f32 -1.442695, %v2054_v12  ;;  %v3478_v43 = vpop.eup %3477  ;;  %v2122_v45 = vadd.f32 1.0, %v3476_v13 }
 0x458   : > { %v2000_v38 = vpop.xlane.xlu1 %1999  ;;  %3493 = vrcp.f32 %v2124_v6  ;;  %v3480_v18 = vpop.eup %3479 }
 0x459   : > { %v2053_v41 = vadd.f32 %v4147_v49, %v2000_v38  ;;  %3495 = vpow2.f32 %v2856_v19  ;;  %v2270_v19 = vld [vmem:[#allocation4] sm:$0xff] }
 0x45a   : > { %v3482_v54 = vpop.eup %3481  ;;  %3497 = vrcp.f32 %v2122_v45 }
 0x45b   : > { %2232 = vperm.xlu1 %3317, %v3478_v43   ;;  %v2855_v52 = vmul.f32 -1.442695, %v2053_v41  ;;  %v3484_v62 = vpop.eup %3483  ;;  %v2121_v1 = vadd.f32 1.0, %v3482_v54 }
 0x45d   : > { %3499 = vpow2.f32 %v2855_v52 }
 0x45e   : > { %v3486_v0 = vpop.eup %3485  ;;  %3501 = vrcp.f32 %v2121_v1 }
 0x45f   : > { %2227 = vperm.xlu1 %3317, %v3480_v18   ;;  %v2120_v49 = vadd.f32 1.0, %v3486_v0 }
 0x461   : > { %3503 = vrcp.f32 %v2120_v49 }
 0x462   : > { %v3488_v3 = vpop.eup %3487 }
 0x463   : > { %2242 = vperm.xlu1 %3317, %v3484_v62   ;;  %2197 = vperm.xlu0 %3318, %v3488_v3   ;;  %v3490_v47 = vpop.eup %3489 }
 0x464   : > { %v3492_v2 = vpop.eup %3491 }
 0x465   : > { %v3494_v4 = vpop.eup %3493  ;;  %v2119_v7 = vadd.f32 1.0, %v3492_v2 }
 0x466   : > { %v3496_v8 = vpop.eup %3495 }
 0x467   : > { %2237 = vperm.xlu1 %3317, %v3490_v47   ;;  %v3498_v61 = vpop.eup %3497  ;;  %3505 = vrcp.f32 %v2119_v7  ;;  %v2118_v42 = vadd.f32 1.0, %v3496_v8 }
 0x469   : > { %3507 = vrcp.f32 %v2118_v42 }
 0x46a   : > { %v3500_v11 = vpop.eup %3499 }
 0x46b   : > { %2202 = vperm.xlu1 %3317, %v3494_v4   ;;  %v2117_v48 = vadd.f32 1.0, %v3500_v11  ;;  %v3502_v53 = vpop.eup %3501 }
 0x46d   : > { %3509 = vrcp.f32 %v2117_v48 }
 0x46e   : > { %v3504_v14 = vpop.eup %3503 }
 0x46f   : > { %2192 = vperm.xlu1 %3317, %v3498_v61  }
 0x473   : > { %2187 = vperm.xlu1 %3317, %v3502_v53  }
 0x474   : > { %v3506_v39 = vpop.eup %3505 }
 0x476   : > { %v3508_v55 = vpop.eup %3507 }
 0x477   : > { %2182 = vperm.xlu1 %3317, %v3504_v14  }
 0x47a   : > { %v3510_v16 = vpop.eup %3509 }
 0x47b   : > { %2177 = vperm.xlu1 %3317, %v3506_v39  }
 0x47f   : > { %2172 = vperm.xlu1 %3317, %v3508_v55  }
 0x483   : > { %2167 = vperm.xlu1 %3317, %v3510_v16  }
 0x4c6   : > { %v2213_v17 = vpop.permute.xlu1 %2212 }
 0x4ca   : > { %v2208_v57 = vpop.permute.xlu1 %2207 }
 0x4cb   : > { %v2253_v37 = vmul.f32 %v2208_v57, %v4070_v5 }
 0x4ce   : > { %v2223_v28 = vpop.permute.xlu1 %2222 }
 0x4cf   : > { %v2256_v36 = vmul.f32 %v2223_v28, %v4036_v22 }
 0x4d2   : > { %v2218_v20 = vpop.permute.xlu1 %2217 }
 0x4d6   : > { %v2233_v51 = vpop.permute.xlu1 %2232 }
 0x4d7   : > { %v2258_v40 = vmul.f32 %v2233_v51, %v4057_v60 }
 0x4da   : > { %v2228_v63 = vpop.permute.xlu1 %2227 }
 0x4db   : > { %v2257_v30 = vmul.f32 %v2228_v63, %v4084_v21 }
 0x4de   : > { %v2243_v23 = vpop.permute.xlu1 %2242  ;;  %v2198_v21 = vpop.permute.xlu0 %2197 }
 0x4df   : > { %v2260_v25 = vmul.f32 %v2243_v23, %v4090_v29  ;;  %v2255_v29 = vmul.f32 %v2218_v20, %v4045_v32  ;;  %v2251_v59 = vmul.f32 %v2198_v21, %v4102_v58 }
 0x4e1   : > { %3144 = vmatprep.subr.mxu0 %v2260_v25 }
 0x4e2   : > { %3145 = vmatpush3.msra.mxu0 %v2260_v25  ;;  %v2238_v27 = vpop.permute.xlu1 %2237 }
 0x4e3   : > { %v2259_v34 = vmul.f32 %v2238_v27, %v4096_v35  ;;  %v2254_v35 = vmul.f32 %v2213_v17, %v4054_v56 }
 0x4e5   : > { %3146 = vmatprep.subr.mxu0 %v2259_v34 }
 0x4e6   : > { %3147 = vmatpush3.msra.mxu0 %v2259_v34  ;;  %v2203_v10 = vpop.permute.xlu1 %2202 }
 0x4e7   : > { %3148 = vmatprep.subr.mxu0 %v2258_v40  ;;  %v2252_v12 = vmul.f32 %v2203_v10, %v4078_v9 }
 0x4e8   : > { %3149 = vmatpush3.msra.mxu0 %v2258_v40 }
 0x4e9   : > { %3150 = vmatprep.subr.mxu0 %v2257_v30 }
 0x4ea   : > { %3151 = vmatpush3.msra.mxu0 %v2257_v30  ;;  %v2193_v50 = vpop.permute.xlu1 %2192 }
 0x4eb   : > { %3152 = vmatprep.subr.mxu0 %v2256_v36  ;;  %v2250_v32 = vmul.f32 %v2193_v50, %v4108_v15 }
 0x4ec   : > { %3153 = vmatpush3.msra.mxu0 %v2256_v36 }
 0x4ed   : > { %3154 = vmatprep.subr.mxu0 %v2255_v29 }
 0x4ee   : > { %3155 = vmatpush3.msra.mxu0 %v2255_v29  ;;  %v2188_v60 = vpop.permute.xlu1 %2187 }
 0x4ef   : > { %3156 = vmatprep.subr.mxu0 %v2254_v35  ;;  %v2249_v6 = vmul.f32 %v2188_v60, %v4114_v46  ;;  %v2271_v46 = vld [vmem:[#allocation4 + $0x8] sm:$0xff] }
 0x4f0   : > { %3157 = vmatpush3.msra.mxu0 %v2254_v35 }
 0x4f1   : > { %3158 = vmatprep.subr.mxu0 %v2253_v37 }
 0x4f2   : > { %3159 = vmatpush3.msra.mxu0 %v2253_v37  ;;  %v2183_v22 = vpop.permute.xlu1 %2182 }
 0x4f3   : > { %3160 = vmatprep.subr.mxu0 %v2252_v12  ;;  %v2248_v5 = vmul.f32 %v2183_v22, %v4120_v26 }
 0x4f4   : > { %3161 = vmatpush3.msra.mxu0 %v2252_v12 }
 0x4f5   : > { %3162 = vmatprep.subr.mxu0 %v2251_v59 }
 0x4f6   : > { %3163 = vmatpush3.msra.mxu0 %v2251_v59  ;;  %v2178_v56 = vpop.permute.xlu1 %2177 }
 0x4f7   : > { %3164 = vmatprep.subr.mxu0 %v2250_v32  ;;  %v2247_v38 = vmul.f32 %v2178_v56, %v4126_v33 }
 0x4f8   : > { %3165 = vmatpush3.msra.mxu0 %v2250_v32 }
 0x4f9   : > { %3166 = vmatprep.subr.mxu0 %v2249_v6 }
 0x4fa   : > { %3167 = vmatpush3.msra.mxu0 %v2249_v6  ;;  %v2173_v9 = vpop.permute.xlu1 %2172 }
 0x4fb   : > { %3168 = vmatprep.subr.mxu0 %v2248_v5  ;;  %v2246_v58 = vmul.f32 %v2173_v9, %v4132_v44 }
 0x4fc   : > { %3169 = vmatpush3.msra.mxu0 %v2248_v5 }
 0x4fd   : > { %3170 = vmatprep.subr.mxu0 %v2247_v38 }
 0x4fe   : > { %3171 = vmatpush3.msra.mxu0 %v2247_v38  ;;  %v2168_v15 = vpop.permute.xlu1 %2167 }
 0x4ff   : > { %v2245_v13 = vmul.f32 %v2168_v15, %v4138_v24  ;;  %3172 = vmatprep.subr.mxu0 %v2246_v58 }
 0x500   : > { %3173 = vmatpush3.msra.mxu0 %v2246_v58 }
 0x501   : > { %3174 = vmatprep.subr.mxu0 %v2245_v13 }
 0x502   : > { %3175 = vmatpush3.msra.mxu0 %v2245_v13 }
 0x503   : > { %3177 = vmatmul.mubr.f32.vlgmr.msra.gmra.mxu0 %v3760_v31 }
 0x5c3   : > { %v3178_v26 = vpop.f32.mrf.mxu0 }
 0x5c4   : > { %v2348_v41 = vadd.f32 %v3178_v26, %v2271_v46  ;;  %2354 = sbr.rel (%p2872_p6) target bundleno = 1928 (0x788), region = 104 }
 0x5c5   : > { %v2338_v33 = vpop.f32.mrf.mxu0 }
 0x5c6   : > { %2350 = vst.msk [vmem:[#allocation4 + $0x8] sm:$0xff] %vm1669_vm8, %v2348_v41  ;;  %v2347_v43 = vadd.f32 %v2338_v33, %v2270_v19 }
 0x5c8   : > { %2349 = vst.msk [vmem:[#allocation4] sm:$0xff] %vm1669_vm8, %v2347_v43 }
 0x5c9   : > { %v2366_v44 = vld [vmem:[%s4281_s15 + $0x18] sm:$0xff]  ;;  %v2365_v24 = vld [vmem:[%s4281_s15 + $0x10] sm:$0xff]  ;;  %v2364_v18 = vld [vmem:[%s4281_s15 + $0x8] sm:$0xff]  ;;  %v3559_v61 = vmov 0  }
 0x5ca   : > { %v2360_v31 = vld [vmem:[%s4280_s14 + $0x18] sm:$0xff]  ;;  %3179 = vmatprep.subr.mxu0 %v2366_v44  ;;  %v2359_v45 = vld [vmem:[%s4280_s14 + $0x10] sm:$0xff]  ;;  %v2358_v52 = vld [vmem:[%s4280_s14 + $0x8] sm:$0xff]  ;;  %3511 = vset.pattern.permute.xlu0 %v3559_v61 }
 0x5cb   : > { %3190 = vmatprep.subr.mxu1 %v2360_v31  ;;  %3180 = vmatpush3.msra.mxu0 %v2366_v44  ;;  %v2363_v54 = vld [vmem:[%s4281_s15] sm:$0xff]  ;;  %v2356_v47 = vld [vmem:[%s4305_s26 + $0x8] sm:$0xff]  ;;  %v2555_v49 = vld [vmem:[%s4283_s17 + $0x18] sm:$0xff] }
 0x5cc   : > { %3191 = vmatpush3.msra.mxu1 %v2360_v31  ;;  %3181 = vmatprep.subr.mxu0 %v2365_v24  ;;  %v2357_v62 = vld [vmem:[%s4280_s14] sm:$0xff]  ;;  %v2554_v2 = vld [vmem:[%s4283_s17 + $0x10] sm:$0xff]  ;;  %v2553_v4 = vld [vmem:[%s4283_s17 + $0x8] sm:$0xff] }
 0x5cd   : > { %3192 = vmatprep.subr.mxu1 %v2359_v45  ;;  %3182 = vmatpush3.msra.mxu0 %v2365_v24  ;;  %v4212_v1 = vld [vmem:[%s4305_s26] sm:$0xff]  ;;  %v2362_v3 = vld [vmem:[#allocation4 + $0x8] sm:$0xff] }
 0x5ce   : > { %3193 = vmatpush3.msra.mxu1 %v2359_v45  ;;  %3183 = vmatprep.subr.mxu0 %v2364_v18  ;;  %v2552_v7 = vld [vmem:[%s4283_s17] sm:$0xff]  ;;  %v2647_v42 = vld [vmem:[%s4306_s25 + $0x8] sm:$0xff] }
 0x5cf   : > { %3194 = vmatprep.subr.mxu1 %v2358_v52  ;;  %v2361_v0 = vld [vmem:[#allocation4] sm:$0xff]  ;;  %3184 = vmatpush3.msra.mxu0 %v2364_v18 }
 0x5d0   : > { %3195 = vmatpush3.msra.mxu1 %v2358_v52  ;;  %3185 = vmatprep.subr.mxu0 %v2363_v54  ;;  %v2646_v8 = vld [vmem:[%s4306_s25] sm:$0xff] }
 0x5d1   : > { %3196 = vmatprep.subr.mxu1 %v2357_v62  ;;  %3186 = vmatpush3.msra.mxu0 %v2363_v54  ;;  %v2877_v53 = vld [vmem:[%s4307_s3] ss:$0 sm:$0xff] }
 0x5d2   : > { %3187 = vmatprep.mubr.msk.f32.mxu0 %vm1669_vm8, %v2361_v0  ;;  %3197 = vmatpush3.msra.mxu1 %v2357_v62  ;;  %v2880_v36 = vld [vmem:[%s4308_s29] ss:$0 sm:$0xff] }
 0x5d3   : > { %3198 = vmatprep.mubr.msk.f32.mxu1 %vm1669_vm8, %v4212_v1  ;;  %3188 = vmatmul.mubr.msk.f32.vlgmr.msra.gmra.mxu0 %vm1669_vm8, %v2362_v3 }
 0x5d4   : > { %3199 = vmatmul.mubr.msk.f32.vlgmr.msra.gmra.mxu1 %vm1669_vm8, %v2356_v47  ;;  %3201 = vmatprep.subr.mxu0 %v2555_v49 }
 0x5d5   : > { %3202 = vmatpush3.msra.mxu0 %v2555_v49  ;;  %2650 = vperm.xlu0 %3511, %v2646_v8  }
 0x5d6   : > { %3203 = vmatprep.subr.mxu0 %v2554_v2 }
 0x5d7   : > { %3204 = vmatpush3.msra.mxu0 %v2554_v2 }
 0x5d8   : > { %3205 = vmatprep.subr.mxu0 %v2553_v4 }
 0x5d9   : > { %3206 = vmatpush3.msra.mxu0 %v2553_v4  ;;  %2655 = vperm.xlu0 %3511, %v2647_v42  }
 0x5da   : > { %3207 = vmatprep.subr.mxu0 %v2552_v7 }
 0x5db   : > { %3208 = vmatpush3.msra.mxu0 %v2552_v7 }
 0x650   : > { %v2651_v30 = vpop.permute.xlu0 %2650 }
 0x654   : > { %v2656_v21 = vpop.permute.xlu0 %2655 }
 0x693   : > { %v3189_v11 = vpop.f32.mrf.mxu0 }
 0x694   : > { %v3200_v48 = vpop.f32.mrf.mxu1 }
 0x695   : > { %v2526_v14 = vadd.f32 %v3200_v48, %v3189_v11  ;;  %v2439_v39 = vpop.f32.mrf.mxu0 }
 0x696   : > { %v2520_v55 = vpop.f32.mrf.mxu1 }
 0x697   : > { %v2537_v16 = vadd.f32 %v2877_v53, %v2526_v14  ;;  %v2521_v17 = vadd.f32 %v2520_v55, %v2439_v39 }
 0x699   : > { %v2879_v57 = vmul.f32 -1.442695, %v2537_v16  ;;  %v2536_v28 = vadd.f32 %v2877_v53, %v2521_v17 }
 0x69b   : > { %3512 = vpow2.f32 %v2879_v57  ;;  %v2878_v20 = vmul.f32 -1.442695, %v2536_v28 }
 0x69d   : > { %3514 = vpow2.f32 %v2878_v20 }
 0x6a8   : > { %v3513_v51 = vpop.eup %3512 }
 0x6a9   : > { %v2545_v63 = vadd.f32 1.0, %v3513_v51 }
 0x6aa   : > { %v3515_v23 = vpop.eup %3514 }
 0x6ab   : > { %v2544_v25 = vadd.f32 1.0, %v3515_v23  ;;  %3516 = vrcp.f32 %v2545_v63 }
 0x6ad   : > { %3518 = vrcp.f32 %v2544_v25 }
 0x6b8   : > { %v3517_v27 = vpop.eup %3516 }
 0x6b9   : > { %v2551_v10 = vmul.f32 %v3517_v27, %v2537_v16 }
 0x6ba   : > { %v3519_v34 = vpop.eup %3518 }
 0x6bb   : > { %v2550_v40 = vmul.f32 %v3519_v34, %v2536_v28 }
 0x6bd   : > { %3209 = vmatprep.mubr.msk.f32.mxu0 %vm1669_vm8, %v2550_v40 }
 0x6be   : > { %3210 = vmatmul.mubr.msk.f32.vlgmr.msra.gmra.mxu0 %vm1669_vm8, %v2551_v10 }
 0x77e   : > { %v3211_v50 = vpop.f32.mrf.mxu0 }
 0x77f   : > { %v2641_v29 = vadd.f32 %v3211_v50, %v2880_v36 }
 0x780   : > { %v2635_v35 = vpop.f32.mrf.mxu0 }
 0x781   : > { %v2645_v60 = vadd.f32 %v2641_v29, %v2356_v47  ;;  %v2636_v37 = vadd.f32 %v2880_v36, %v2635_v35 }
 0x783   : > { %v2659_v12 = vmul.f32 %v2656_v21, %v2645_v60  ;;  %v2644_v22 = vadd.f32 %v2636_v37, %v4212_v1 }
 0x785   : > { %2661 = vst.msk [vmem:[#allocation6 + $0x8] sm:$0xff] %vm1669_vm8, %v2659_v12  ;;  %v2658_v59 = vmul.f32 %v2651_v30, %v2644_v22 }
 0x787   : > { %2660 = vst.msk [vmem:[#allocation6] sm:$0xff] %vm1669_vm8, %v2658_v59 }
 0x788 PF: > { %p3216_p7 = scmp.eq.s32.totalorder %s3672_s21, 1  ;;  %s3560_s0 = smov [#allocation6]  }
 0x789   : > { %s2668_s1 = sshll.u32 %s3560_s0, 4  ;;  %s2669_s1 = int_to_ptr.vmem [resolvable:$true] %s2668_s1 }
 0x78a   : > { %s3520_s24 = scalar_lea.vmem %s2669_s1, 256  ;;  %p3527_p11 = scmp.lt.s32.totalorder %s2669_s1, %s2669_s1 }
 0x78b   : > { %p3521_p8 = scmp.ne.s32.totalorder %s2669_s1, %s3520_s24  ;;  %p3528_p12 = scmp.lt.s32.totalorder %s3520_s24, %s3520_s24 }
 0x78d   : > { %p3522_p9 = pnand %p3521_p8, %p3216_p7  ;;  %p3529_p13 = por %p3528_p12, %p3527_p11 }
 0x78f   : > { %p3523_p10 = pneg %p3522_p9 }
 0x791   : > { %p3530_p0 = pnand %p3529_p13, %p3523_p10 }
 0x793   : > { %3533 = shalt.err (!%p3530_p0)
}
 0x794   : > { %s3561_s27 = smov 128   ;;  %s3562_s30 = smov 8  }
 0x795   : > { %s4309_s23 = sld [smem:[#allocation17_spill]] }
 0x79b   : > { %3213 = dma.vmem_to_hbm [thread:$0]  (%p3216_p7), %s2669_s1, 256, %s4309_s23, [#allocation7], %s3561_s27, %s3561_s27, %s3562_s30  }
 0x79c   : > { %3549 = dma.done.wait (%p3216_p7), [#allocation7], 256  }
 0x79d   : > { %3551 = vsyncadd (%p3216_p7), [#allocation7], 4294967040 }
 0x79e PF: > { %s4310_s13 = sld [smem:[#allocation9_spill]] }
 0x7a4   : > { %s32_s20 = sadd.s32 1, %s4310_s13  }
 0x7a5   : > { %p29_p1 = scmp.ge.s32.totalorder %s32_s20, 4  }
 0x7a7   :  { %31 = sbr.rel (!%p29_p1) target bundleno = 10 (0xa), region = 140 }
 0x7ac   :  { %2684 = vsyncpa [#allocation7], 1 }
 0x7ad   :  { %2686 = vsyncpa [#allocation7 + $0x1], 1 }

</bundles_post_ra>
